<compile_context>
chip_gen: v7x
topology: tpu7x:2x2x1
jax: 0.10.0
libtpu: 0.0.40
codegen_flags: <defaults>
</compile_context>

<pallas_src>
import functools
import math

import jax
import jax.numpy as jnp
from jax import lax
from jax.experimental import pallas as pl
from jax.experimental.pallas import tpu as pltpu


def _layernorm(x, gamma, beta, eps=1e-5):
    # F.layer_norm over the last dim (biased variance), gamma/beta affine. f32 math.
    mu = jnp.mean(x, axis=-1, keepdims=True)
    var = jnp.mean((x - mu) ** 2, axis=-1, keepdims=True)
    return (x - mu) * lax.rsqrt(var + eps) * gamma + beta


def transformer_block_kernel(
    x_ref,                 # (bt*N, D)  residual stream rows for this batch tile
    g1_ref, b1_ref,        # (1, D)     pre_norm gamma/beta (f32)
    wqkv_ref,              # (D, 3D)    to_qkv weight, q-columns pre-scaled (compute dtype)
    wout_ref,              # (D, D)     to_out weight (compute dtype)
    g2_ref, b2_ref,        # (1, D)     ff_norm gamma/beta (f32)
    wglu_ref, bglu_ref,    # (D, 2*inner) compute dtype, (1, 2*inner) f32
    wff_ref, bff_ref,      # (inner, D)  compute dtype, (1, D) f32
    o_ref,                 # (bt*N, D)
    *, bt, seq, num_heads, dim_heads, compute_dtype):
    cdt = compute_dtype
    D = num_heads * dim_heads

    # Hoist parameter loads / broadcast sources once (JAX does not CSE broadcasts).
    g1 = g1_ref[...]
    b1 = b1_ref[...]
    g2 = g2_ref[...]
    b2 = b2_ref[...]
    bglu = bglu_ref[...]
    bff = bff_ref[...]

    x = x_ref[...].astype(jnp.float32)                     # (M, D), residual in f32

    # ---------------- self-attention branch ----------------
    h = _layernorm(x, g1, b1)
    qkv = jnp.dot(h.astype(cdt), wqkv_ref[...],
                  preferred_element_type=jnp.float32)      # (M, 3D), f32 accumulation

    attn_rows = []
    for b in range(bt):                                    # static loop over batch tile
        r0 = b * seq
        acc = None
        for hd in range(num_heads):                        # static loop over heads
            c0 = hd * dim_heads
            qh = qkv[r0:r0 + seq, c0:c0 + dim_heads].astype(cdt)            # (N, Dh)
            kh = qkv[r0:r0 + seq, D + c0:D + c0 + dim_heads].astype(cdt)    # (N, Dh)
            vh = qkv[r0:r0 + seq, 2 * D + c0:2 * D + c0 + dim_heads]        # (N, Dh)

            # q @ k^T: contract last dims directly (no explicit transpose of K).
            s = lax.dot_general(qh, kh, (((1,), (1,)), ((), ())),
                                preferred_element_type=jnp.float32)         # (N, N)
            # softmax (scale already folded into Wqkv's q-columns), f32 VPU/EUP math
            m = jnp.max(s, axis=-1, keepdims=True)
            p = jnp.exp(s - m)
            inv = pl.reciprocal(jnp.sum(p, axis=-1, keepdims=True), approx=True)
            attn = p * inv
            oh = jnp.dot(attn.astype(cdt), vh.astype(cdt),
                         preferred_element_type=jnp.float32)                # (N, Dh)
            # Fold 'h n d -> n (h d)' + to_out into per-head partial projections.
            part = jnp.dot(oh.astype(cdt), wout_ref[c0:c0 + dim_heads, :],
                           preferred_element_type=jnp.float32)              # (N, D)
            acc = part if acc is None else acc + part
        attn_rows.append(acc)
    attn_out = attn_rows[0] if bt == 1 else jnp.concatenate(attn_rows, axis=0)

    x = x + attn_out                                        # residual add, f32

    # ---------------- feed-forward (GLU + SiLU) branch ----------------
    h2 = _layernorm(x, g2, b2)
    pg = jnp.dot(h2.astype(cdt), wglu_ref[...],
                 preferred_element_type=jnp.float32) + bglu                 # (M, 2*inner)
    inner = pg.shape[-1] // 2
    a = pg[:, :inner]
    gate = pg[:, inner:]
    ffh = a * (gate * jax.nn.sigmoid(gate))                 # x * SiLU(gate), f32 VPU
    ff = jnp.dot(ffh.astype(cdt), wff_ref[...],
                 preferred_element_type=jnp.float32) + bff
    x = x + ff

    o_ref[...] = x.astype(o_ref.dtype)


def _pick_batch_tile(B, N, max_rows=1024):
    # Largest divisor of B whose row tile (bt*N) stays <= max_rows and is 8-sublane
    # aligned (a full-array block is always legal). Fuses batch into the matmul M dim.
    for bt in range(B, 0, -1):
        if B % bt:
            continue
        rows = bt * N
        if rows <= max_rows and (rows % 8 == 0 or bt == B):
            return bt
    return B


def transformer_block(x, params, *, num_heads, dim_heads,
                      compute_dtype=jnp.bfloat16):
    B, N, D = x.shape
    assert D == num_heads * dim_heads
    inner = params['wff'].shape[0]
    bt = _pick_batch_tile(B, N)
    M = bt * N
    grid = (B // bt,)
    cdt = compute_dtype

    # Fold the softmax scale into the q-columns of Wqkv (no per-score multiply).
    scale = 1.0 / math.sqrt(dim_heads)
    wqkv = params['wqkv'].astype(jnp.float32)
    wqkv = wqkv.at[:, :D].multiply(scale)

    # Weights pre-cast to the MXU compute dtype once in the wrapper (no per-step cast).
    wqkv_c = wqkv.astype(cdt)
    wout_c = params['wout'].astype(cdt)
    wglu_c = params['wglu'].astype(cdt)
    wff_c = params['wff'].astype(cdt)

    # 1-D params reshaped to lane-major (1, D) slabs; kept f32 (VPU math).
    g1 = params['g1'].astype(jnp.float32).reshape(1, D)
    b1 = params['b1'].astype(jnp.float32).reshape(1, D)
    g2 = params['g2'].astype(jnp.float32).reshape(1, D)
    b2 = params['b2'].astype(jnp.float32).reshape(1, D)
    bglu = params['bglu'].astype(jnp.float32).reshape(1, 2 * inner)
    bff = params['bff'].astype(jnp.float32).reshape(1, D)

    x_flat = x.reshape(B * N, D)

    kernel = functools.partial(
        transformer_block_kernel,
        bt=bt, seq=N, num_heads=num_heads, dim_heads=dim_heads,
        compute_dtype=cdt)

    rep = lambda g: (0, 0)
    in_specs = [
        pl.BlockSpec((M, D), lambda g: (g, 0)),        # x rows for this batch tile
        pl.BlockSpec((1, D), rep),                     # pre_norm gamma
        pl.BlockSpec((1, D), rep),                     # pre_norm beta
        pl.BlockSpec((D, 3 * D), rep),                 # Wqkv (scaled q cols)
        pl.BlockSpec((D, D), rep),                     # Wout
        pl.BlockSpec((1, D), rep),                     # ff_norm gamma
        pl.BlockSpec((1, D), rep),                     # ff_norm beta
        pl.BlockSpec((D, 2 * inner), rep),             # Wglu
        pl.BlockSpec((1, 2 * inner), rep),             # bglu
        pl.BlockSpec((inner, D), rep),                 # Wff
        pl.BlockSpec((1, D), rep),                     # bff
    ]
    out_specs = pl.BlockSpec((M, D), lambda g: (g, 0))

    # Advisory cost estimate so XLA can overlap neighbours with this custom call.
    rows = B * N
    flops = (2 * rows * (D * 3 * D + D * D + D * 2 * inner + inner * D)
             + 4 * B * num_heads * N * N * dim_heads)
    transcendentals = B * num_heads * N * N + rows * inner
    bytes_accessed = (
        2 * rows * D * x.dtype.itemsize
        + wqkv_c.size * wqkv_c.dtype.itemsize
        + wout_c.size * wout_c.dtype.itemsize
        + wglu_c.size * wglu_c.dtype.itemsize
        + wff_c.size * wff_c.dtype.itemsize
        + (g1.size + b1.size + g2.size + b2.size + bglu.size + bff.size) * 4)

    out_flat = pl.pallas_call(
        kernel,
        out_shape=jax.ShapeDtypeStruct((B * N, D), x.dtype),
        grid_spec=pltpu.PrefetchScalarGridSpec(
            num_scalar_prefetch=0,
            grid=grid,
            in_specs=in_specs,
            out_specs=out_specs,
        ),
        compiler_params=pltpu.CompilerParams(
            dimension_semantics=("parallel",)),
        cost_estimate=pl.CostEstimate(
            flops=int(flops),
            transcendentals=int(transcendentals),
            bytes_accessed=int(bytes_accessed)),
    )(x_flat, g1, b1, wqkv_c, wout_c, g2, b2, wglu_c, bglu, wff_c, bff)

    return out_flat.reshape(B, N, D)


# ------------------------- pure-JAX reference -------------------------
def transformer_block_ref(x, params, *, num_heads, dim_heads):
    B, N, D = x.shape
    h = _layernorm(x, params['g1'], params['b1'])
    qkv = h @ params['wqkv']
    q, k, v = jnp.split(qkv, 3, axis=-1)

    def to_heads(t):
        return t.reshape(B, N, num_heads, dim_heads).transpose(0, 2, 1, 3)

    q, k, v = to_heads(q), to_heads(k), to_heads(v)
    scores = jnp.einsum('bhnd,bhmd->bhnm', q, k) / (dim_heads ** 0.5)
    attn = jax.nn.softmax(scores, axis=-1)
    o = jnp.einsum('bhnm,bhmd->bhnd', attn, v)
    o = o.transpose(0, 2, 1, 3).reshape(B, N, D)
    x = x + o @ params['wout']

    h2 = _layernorm(x, params['g2'], params['b2'])
    pg = h2 @ params['wglu'] + params['bglu']
    a, gate = jnp.split(pg, 2, axis=-1)
    ff_h = a * (gate * jax.nn.sigmoid(gate))
    x = x + ff_h @ params['wff'] + params['bff']
    return x


if __name__ == "__main__":
    B, N, D = 2, 16, 128
    dim_heads = 64
    num_heads = D // dim_heads
    inner = 4 * D

    key = jax.random.PRNGKey(0)
    ks = jax.random.split(key, 8)
    # NOTE: the module zero-inits to_out / FF-out (zero_init_branch_outputs=True),
    # which would make the block an identity.  We use small random weights so the
    # kernel hot path is exercised; forward-pass semantics are unchanged.
    params = {
        'g1': jnp.ones((D,), jnp.float32),
        'b1': jnp.zeros((D,), jnp.float32),
        'wqkv': 0.05 * jax.random.normal(ks[0], (D, 3 * D), jnp.float32),
        'wout': 0.05 * jax.random.normal(ks[1], (D, D), jnp.float32),
        'g2': jnp.ones((D,), jnp.float32),
        'b2': jnp.zeros((D,), jnp.float32),
        'wglu': 0.05 * jax.random.normal(ks[2], (D, 2 * inner), jnp.float32),
        'bglu': 0.05 * jax.random.normal(ks[3], (2 * inner,), jnp.float32),
        'wff': 0.05 * jax.random.normal(ks[4], (inner, D), jnp.float32),
        'bff': 0.05 * jax.random.normal(ks[5], (D,), jnp.float32),
    }
    x = jax.random.normal(ks[6], (B, N, D), jnp.float32)

    ref = transformer_block_ref(x, params, num_heads=num_heads, dim_heads=dim_heads)

    # f32 MXU path: tight numerical check of the kernel structure.
    out_f32 = transformer_block(x, params, num_heads=num_heads, dim_heads=dim_heads,
                                compute_dtype=jnp.float32)
    out_f32 = jax.block_until_ready(out_f32)
    assert out_f32.shape == (B, N, D)
    assert jnp.allclose(out_f32, ref, atol=1e-3, rtol=1e-3), \
        f"f32 max abs err {jnp.max(jnp.abs(out_f32 - ref))}"

    # bf16-MXU path (default perf path on v6e/v7x): f32 accumulation + residuals,
    # so only bf16 operand rounding shows up — checked at a looser tolerance.
    out_bf16 = transformer_block(x, params, num_heads=num_heads, dim_heads=dim_heads,
                                 compute_dtype=jnp.bfloat16)
    out_bf16 = jax.block_until_ready(out_bf16)
    assert out_bf16.shape == (B, N, D)
    assert jnp.allclose(out_bf16, ref, atol=5e-2, rtol=5e-2), \
        f"bf16 max abs err {jnp.max(jnp.abs(out_bf16 - ref))}"

    print("KERNEL_OK")
</pallas_src>

<mosaic_0001>
module attributes {stable_mosaic.version = 11 : i64} {
  func.func @transformer_block_kernel(%arg0: i32, %arg1: memref<32x128xf32, #tpu.memory_space<vmem>>, %arg2: memref<1x128xf32, #tpu.memory_space<vmem>>, %arg3: memref<1x128xf32, #tpu.memory_space<vmem>>, %arg4: memref<128x384xf32, #tpu.memory_space<vmem>>, %arg5: memref<128x128xf32, #tpu.memory_space<vmem>>, %arg6: memref<1x128xf32, #tpu.memory_space<vmem>>, %arg7: memref<1x128xf32, #tpu.memory_space<vmem>>, %arg8: memref<128x1024xf32, #tpu.memory_space<vmem>>, %arg9: memref<1x1024xf32, #tpu.memory_space<vmem>>, %arg10: memref<512x128xf32, #tpu.memory_space<vmem>>, %arg11: memref<1x128xf32, #tpu.memory_space<vmem>>, %arg12: memref<32x128xf32, #tpu.memory_space<vmem>>) attributes {dimension_semantics = [#tpu.dimension_semantics<parallel>], iteration_bounds = array<i64: 1>, scalar_prefetch = 0 : i64, scratch_operands = 0 : i64, tpu.core_type = #tpu.core_type<tc>, window_params = [{transform_indices = @transform_0, window_bounds = array<i64: 32, 128>}, {pipeline_mode = #tpu.pipeline_mode<synchronous>, transform_indices = @transform_1, window_bounds = array<i64: 1, 128>}, {pipeline_mode = #tpu.pipeline_mode<synchronous>, transform_indices = @transform_2, window_bounds = array<i64: 1, 128>}, {pipeline_mode = #tpu.pipeline_mode<synchronous>, transform_indices = @transform_3, window_bounds = array<i64: 128, 384>}, {pipeline_mode = #tpu.pipeline_mode<synchronous>, transform_indices = @transform_4, window_bounds = array<i64: 128, 128>}, {pipeline_mode = #tpu.pipeline_mode<synchronous>, transform_indices = @transform_5, window_bounds = array<i64: 1, 128>}, {pipeline_mode = #tpu.pipeline_mode<synchronous>, transform_indices = @transform_6, window_bounds = array<i64: 1, 128>}, {pipeline_mode = #tpu.pipeline_mode<synchronous>, transform_indices = @transform_7, window_bounds = array<i64: 128, 1024>}, {pipeline_mode = #tpu.pipeline_mode<synchronous>, transform_indices = @transform_8, window_bounds = array<i64: 1, 1024>}, {pipeline_mode = #tpu.pipeline_mode<synchronous>, transform_indices = @transform_9, window_bounds = array<i64: 512, 128>}, {pipeline_mode = #tpu.pipeline_mode<synchronous>, transform_indices = @transform_10, window_bounds = array<i64: 1, 128>}, {transform_indices = @transform_11, window_bounds = array<i64: 32, 128>}]} {
    %c0 = arith.constant 0 : index
    %c0_0 = arith.constant 0 : index
    %0 = vector.load %arg2[%c0, %c0_0] : memref<1x128xf32, #tpu.memory_space<vmem>>, vector<1x128xf32>
    %c0_1 = arith.constant 0 : index
    %c0_2 = arith.constant 0 : index
    %1 = vector.load %arg3[%c0_1, %c0_2] : memref<1x128xf32, #tpu.memory_space<vmem>>, vector<1x128xf32>
    %c0_3 = arith.constant 0 : index
    %c0_4 = arith.constant 0 : index
    %2 = vector.load %arg6[%c0_3, %c0_4] : memref<1x128xf32, #tpu.memory_space<vmem>>, vector<1x128xf32>
    %c0_5 = arith.constant 0 : index
    %c0_6 = arith.constant 0 : index
    %3 = vector.load %arg7[%c0_5, %c0_6] : memref<1x128xf32, #tpu.memory_space<vmem>>, vector<1x128xf32>
    %c0_7 = arith.constant 0 : index
    %c0_8 = arith.constant 0 : index
    %4 = vector.load %arg9[%c0_7, %c0_8] : memref<1x1024xf32, #tpu.memory_space<vmem>>, vector<1x1024xf32>
    %c0_9 = arith.constant 0 : index
    %c0_10 = arith.constant 0 : index
    %5 = vector.load %arg11[%c0_9, %c0_10] : memref<1x128xf32, #tpu.memory_space<vmem>>, vector<1x128xf32>
    %c0_11 = arith.constant 0 : index
    %c0_12 = arith.constant 0 : index
    %6 = vector.load %arg1[%c0_11, %c0_12] : memref<32x128xf32, #tpu.memory_space<vmem>>, vector<32x128xf32>
    %cst = arith.constant dense<0.000000e+00> : vector<32xf32>
    %7 = vector.multi_reduction <add>, %6, %cst [1] : vector<32x128xf32> to vector<32xf32>
    %8 = vector.shape_cast %7 : vector<32xf32> to vector<32x1xf32>
    %cst_13 = arith.constant 1.280000e+02 : f32
    %9 = vector.broadcast %cst_13 : f32 to vector<32x1xf32>
    %10 = arith.divf %8, %9 : vector<32x1xf32>
    %11 = vector.broadcast %10 : vector<32x1xf32> to vector<32x128xf32>
    %12 = arith.subf %6, %11 : vector<32x128xf32>
    %13 = arith.mulf %12, %12 : vector<32x128xf32>
    %cst_14 = arith.constant dense<0.000000e+00> : vector<32xf32>
    %14 = vector.multi_reduction <add>, %13, %cst_14 [1] : vector<32x128xf32> to vector<32xf32>
    %15 = vector.shape_cast %14 : vector<32xf32> to vector<32x1xf32>
    %cst_15 = arith.constant 1.280000e+02 : f32
    %16 = vector.broadcast %cst_15 : f32 to vector<32x1xf32>
    %17 = arith.divf %15, %16 : vector<32x1xf32>
    %18 = vector.broadcast %10 : vector<32x1xf32> to vector<32x128xf32>
    %19 = arith.subf %6, %18 : vector<32x128xf32>
    %cst_16 = arith.constant 9.99999974E-6 : f32
    %20 = vector.broadcast %cst_16 : f32 to vector<32x1xf32>
    %21 = arith.addf %17, %20 : vector<32x1xf32>
    %22 = math.rsqrt %21 : vector<32x1xf32>
    %23 = vector.broadcast %22 : vector<32x1xf32> to vector<32x128xf32>
    %24 = arith.mulf %19, %23 : vector<32x128xf32>
    %25 = vector.broadcast %0 : vector<1x128xf32> to vector<32x128xf32>
    %26 = arith.mulf %24, %25 : vector<32x128xf32>
    %27 = vector.broadcast %1 : vector<1x128xf32> to vector<32x128xf32>
    %28 = arith.addf %26, %27 : vector<32x128xf32>
    %c0_17 = arith.constant 0 : index
    %c0_18 = arith.constant 0 : index
    %29 = vector.load %arg4[%c0_17, %c0_18] : memref<128x384xf32, #tpu.memory_space<vmem>>, vector<128x384xf32>
    %cst_19 = arith.constant dense<0.000000e+00> : vector<32x384xf32>
    %30 = tpu.matmul %28, %29, %cst_19 {dimension_numbers = #tpu.dot_dimension_numbers<[1], [0], [0], [1], [0, 0, 1, 1], [], []>} : vector<32x128xf32>, vector<128x384xf32>, vector<32x384xf32> -> vector<32x384xf32>
    %31 = vector.extract_strided_slice %30 {offsets = [0, 0], sizes = [16, 64], strides = [1, 1]} : vector<32x384xf32> to vector<16x64xf32>
    %32 = vector.extract_strided_slice %30 {offsets = [0, 128], sizes = [16, 64], strides = [1, 1]} : vector<32x384xf32> to vector<16x64xf32>
    %33 = vector.extract_strided_slice %30 {offsets = [0, 256], sizes = [16, 64], strides = [1, 1]} : vector<32x384xf32> to vector<16x64xf32>
    %cst_20 = arith.constant dense<0.000000e+00> : vector<16x16xf32>
    %34 = tpu.matmul %31, %32, %cst_20 {dimension_numbers = #tpu.dot_dimension_numbers<[1], [1], [0], [0], [0, 0, 1, 0], [], []>} : vector<16x64xf32>, vector<16x64xf32>, vector<16x16xf32> -> vector<16x16xf32>
    %cst_21 = arith.constant dense<0xFF800000> : vector<16xf32>
    %35 = vector.multi_reduction <maximumf>, %34, %cst_21 [1] : vector<16x16xf32> to vector<16xf32>
    %36 = vector.shape_cast %35 : vector<16xf32> to vector<16x1xf32>
    %37 = vector.broadcast %36 : vector<16x1xf32> to vector<16x16xf32>
    %38 = arith.subf %34, %37 : vector<16x16xf32>
    %39 = math.exp %38 : vector<16x16xf32>
    %cst_22 = arith.constant dense<0.000000e+00> : vector<16xf32>
    %40 = vector.multi_reduction <add>, %39, %cst_22 [1] : vector<16x16xf32> to vector<16xf32>
    %41 = vector.shape_cast %40 : vector<16xf32> to vector<16x1xf32>
    %42 = tpu.reciprocal %41 {approx = true} : vector<16x1xf32> -> vector<16x1xf32>
    %43 = vector.broadcast %42 : vector<16x1xf32> to vector<16x16xf32>
    %44 = arith.mulf %39, %43 : vector<16x16xf32>
    %cst_23 = arith.constant dense<0.000000e+00> : vector<16x64xf32>
    %45 = tpu.matmul %44, %33, %cst_23 {dimension_numbers = #tpu.dot_dimension_numbers<[1], [0], [0], [1], [0, 0, 1, 1], [], []>} : vector<16x16xf32>, vector<16x64xf32>, vector<16x64xf32> -> vector<16x64xf32>
    %c0_24 = arith.constant 0 : index
    %c0_25 = arith.constant 0 : index
    %46 = vector.load %arg5[%c0_24, %c0_25] : memref<128x128xf32, #tpu.memory_space<vmem>>, vector<64x128xf32>
    %cst_26 = arith.constant dense<0.000000e+00> : vector<16x128xf32>
    %47 = tpu.matmul %45, %46, %cst_26 {dimension_numbers = #tpu.dot_dimension_numbers<[1], [0], [0], [1], [0, 0, 1, 1], [], []>} : vector<16x64xf32>, vector<64x128xf32>, vector<16x128xf32> -> vector<16x128xf32>
    %48 = vector.extract_strided_slice %30 {offsets = [0, 64], sizes = [16, 64], strides = [1, 1]} : vector<32x384xf32> to vector<16x64xf32>
    %49 = vector.extract_strided_slice %30 {offsets = [0, 192], sizes = [16, 64], strides = [1, 1]} : vector<32x384xf32> to vector<16x64xf32>
    %50 = vector.extract_strided_slice %30 {offsets = [0, 320], sizes = [16, 64], strides = [1, 1]} : vector<32x384xf32> to vector<16x64xf32>
    %cst_27 = arith.constant dense<0.000000e+00> : vector<16x16xf32>
    %51 = tpu.matmul %48, %49, %cst_27 {dimension_numbers = #tpu.dot_dimension_numbers<[1], [1], [0], [0], [0, 0, 1, 0], [], []>} : vector<16x64xf32>, vector<16x64xf32>, vector<16x16xf32> -> vector<16x16xf32>
    %cst_28 = arith.constant dense<0xFF800000> : vector<16xf32>
    %52 = vector.multi_reduction <maximumf>, %51, %cst_28 [1] : vector<16x16xf32> to vector<16xf32>
    %53 = vector.shape_cast %52 : vector<16xf32> to vector<16x1xf32>
    %54 = vector.broadcast %53 : vector<16x1xf32> to vector<16x16xf32>
    %55 = arith.subf %51, %54 : vector<16x16xf32>
    %56 = math.exp %55 : vector<16x16xf32>
    %cst_29 = arith.constant dense<0.000000e+00> : vector<16xf32>
    %57 = vector.multi_reduction <add>, %56, %cst_29 [1] : vector<16x16xf32> to vector<16xf32>
    %58 = vector.shape_cast %57 : vector<16xf32> to vector<16x1xf32>
    %59 = tpu.reciprocal %58 {approx = true} : vector<16x1xf32> -> vector<16x1xf32>
    %60 = vector.broadcast %59 : vector<16x1xf32> to vector<16x16xf32>
    %61 = arith.mulf %56, %60 : vector<16x16xf32>
    %cst_30 = arith.constant dense<0.000000e+00> : vector<16x64xf32>
    %62 = tpu.matmul %61, %50, %cst_30 {dimension_numbers = #tpu.dot_dimension_numbers<[1], [0], [0], [1], [0, 0, 1, 1], [], []>} : vector<16x16xf32>, vector<16x64xf32>, vector<16x64xf32> -> vector<16x64xf32>
    %c64 = arith.constant 64 : index
    %c0_31 = arith.constant 0 : index
    %63 = vector.load %arg5[%c64, %c0_31] : memref<128x128xf32, #tpu.memory_space<vmem>>, vector<64x128xf32>
    %cst_32 = arith.constant dense<0.000000e+00> : vector<16x128xf32>
    %64 = tpu.matmul %62, %63, %cst_32 {dimension_numbers = #tpu.dot_dimension_numbers<[1], [0], [0], [1], [0, 0, 1, 1], [], []>} : vector<16x64xf32>, vector<64x128xf32>, vector<16x128xf32> -> vector<16x128xf32>
    %65 = arith.addf %47, %64 : vector<16x128xf32>
    %66 = vector.extract_strided_slice %30 {offsets = [16, 0], sizes = [16, 64], strides = [1, 1]} : vector<32x384xf32> to vector<16x64xf32>
    %67 = vector.extract_strided_slice %30 {offsets = [16, 128], sizes = [16, 64], strides = [1, 1]} : vector<32x384xf32> to vector<16x64xf32>
    %68 = vector.extract_strided_slice %30 {offsets = [16, 256], sizes = [16, 64], strides = [1, 1]} : vector<32x384xf32> to vector<16x64xf32>
    %cst_33 = arith.constant dense<0.000000e+00> : vector<16x16xf32>
    %69 = tpu.matmul %66, %67, %cst_33 {dimension_numbers = #tpu.dot_dimension_numbers<[1], [1], [0], [0], [0, 0, 1, 0], [], []>} : vector<16x64xf32>, vector<16x64xf32>, vector<16x16xf32> -> vector<16x16xf32>
    %cst_34 = arith.constant dense<0xFF800000> : vector<16xf32>
    %70 = vector.multi_reduction <maximumf>, %69, %cst_34 [1] : vector<16x16xf32> to vector<16xf32>
    %71 = vector.shape_cast %70 : vector<16xf32> to vector<16x1xf32>
    %72 = vector.broadcast %71 : vector<16x1xf32> to vector<16x16xf32>
    %73 = arith.subf %69, %72 : vector<16x16xf32>
    %74 = math.exp %73 : vector<16x16xf32>
    %cst_35 = arith.constant dense<0.000000e+00> : vector<16xf32>
    %75 = vector.multi_reduction <add>, %74, %cst_35 [1] : vector<16x16xf32> to vector<16xf32>
    %76 = vector.shape_cast %75 : vector<16xf32> to vector<16x1xf32>
    %77 = tpu.reciprocal %76 {approx = true} : vector<16x1xf32> -> vector<16x1xf32>
    %78 = vector.broadcast %77 : vector<16x1xf32> to vector<16x16xf32>
    %79 = arith.mulf %74, %78 : vector<16x16xf32>
    %cst_36 = arith.constant dense<0.000000e+00> : vector<16x64xf32>
    %80 = tpu.matmul %79, %68, %cst_36 {dimension_numbers = #tpu.dot_dimension_numbers<[1], [0], [0], [1], [0, 0, 1, 1], [], []>} : vector<16x16xf32>, vector<16x64xf32>, vector<16x64xf32> -> vector<16x64xf32>
    %c0_37 = arith.constant 0 : index
    %c0_38 = arith.constant 0 : index
    %81 = vector.load %arg5[%c0_37, %c0_38] : memref<128x128xf32, #tpu.memory_space<vmem>>, vector<64x128xf32>
    %cst_39 = arith.constant dense<0.000000e+00> : vector<16x128xf32>
    %82 = tpu.matmul %80, %81, %cst_39 {dimension_numbers = #tpu.dot_dimension_numbers<[1], [0], [0], [1], [0, 0, 1, 1], [], []>} : vector<16x64xf32>, vector<64x128xf32>, vector<16x128xf32> -> vector<16x128xf32>
    %83 = vector.extract_strided_slice %30 {offsets = [16, 64], sizes = [16, 64], strides = [1, 1]} : vector<32x384xf32> to vector<16x64xf32>
    %84 = vector.extract_strided_slice %30 {offsets = [16, 192], sizes = [16, 64], strides = [1, 1]} : vector<32x384xf32> to vector<16x64xf32>
    %85 = vector.extract_strided_slice %30 {offsets = [16, 320], sizes = [16, 64], strides = [1, 1]} : vector<32x384xf32> to vector<16x64xf32>
    %cst_40 = arith.constant dense<0.000000e+00> : vector<16x16xf32>
    %86 = tpu.matmul %83, %84, %cst_40 {dimension_numbers = #tpu.dot_dimension_numbers<[1], [1], [0], [0], [0, 0, 1, 0], [], []>} : vector<16x64xf32>, vector<16x64xf32>, vector<16x16xf32> -> vector<16x16xf32>
    %cst_41 = arith.constant dense<0xFF800000> : vector<16xf32>
    %87 = vector.multi_reduction <maximumf>, %86, %cst_41 [1] : vector<16x16xf32> to vector<16xf32>
    %88 = vector.shape_cast %87 : vector<16xf32> to vector<16x1xf32>
    %89 = vector.broadcast %88 : vector<16x1xf32> to vector<16x16xf32>
    %90 = arith.subf %86, %89 : vector<16x16xf32>
    %91 = math.exp %90 : vector<16x16xf32>
    %cst_42 = arith.constant dense<0.000000e+00> : vector<16xf32>
    %92 = vector.multi_reduction <add>, %91, %cst_42 [1] : vector<16x16xf32> to vector<16xf32>
    %93 = vector.shape_cast %92 : vector<16xf32> to vector<16x1xf32>
    %94 = tpu.reciprocal %93 {approx = true} : vector<16x1xf32> -> vector<16x1xf32>
    %95 = vector.broadcast %94 : vector<16x1xf32> to vector<16x16xf32>
    %96 = arith.mulf %91, %95 : vector<16x16xf32>
    %cst_43 = arith.constant dense<0.000000e+00> : vector<16x64xf32>
    %97 = tpu.matmul %96, %85, %cst_43 {dimension_numbers = #tpu.dot_dimension_numbers<[1], [0], [0], [1], [0, 0, 1, 1], [], []>} : vector<16x16xf32>, vector<16x64xf32>, vector<16x64xf32> -> vector<16x64xf32>
    %c64_44 = arith.constant 64 : index
    %c0_45 = arith.constant 0 : index
    %98 = vector.load %arg5[%c64_44, %c0_45] : memref<128x128xf32, #tpu.memory_space<vmem>>, vector<64x128xf32>
    %cst_46 = arith.constant dense<0.000000e+00> : vector<16x128xf32>
    %99 = tpu.matmul %97, %98, %cst_46 {dimension_numbers = #tpu.dot_dimension_numbers<[1], [0], [0], [1], [0, 0, 1, 1], [], []>} : vector<16x64xf32>, vector<64x128xf32>, vector<16x128xf32> -> vector<16x128xf32>
    %100 = arith.addf %82, %99 : vector<16x128xf32>
    %101 = tpu.concatenate %65, %100 in 0 : vector<16x128xf32>, vector<16x128xf32> -> vector<32x128xf32>
    %102 = arith.addf %6, %101 : vector<32x128xf32>
    %cst_47 = arith.constant dense<0.000000e+00> : vector<32xf32>
    %103 = vector.multi_reduction <add>, %102, %cst_47 [1] : vector<32x128xf32> to vector<32xf32>
    %104 = vector.shape_cast %103 : vector<32xf32> to vector<32x1xf32>
    %cst_48 = arith.constant 1.280000e+02 : f32
    %105 = vector.broadcast %cst_48 : f32 to vector<32x1xf32>
    %106 = arith.divf %104, %105 : vector<32x1xf32>
    %107 = vector.broadcast %106 : vector<32x1xf32> to vector<32x128xf32>
    %108 = arith.subf %102, %107 : vector<32x128xf32>
    %109 = arith.mulf %108, %108 : vector<32x128xf32>
    %cst_49 = arith.constant dense<0.000000e+00> : vector<32xf32>
    %110 = vector.multi_reduction <add>, %109, %cst_49 [1] : vector<32x128xf32> to vector<32xf32>
    %111 = vector.shape_cast %110 : vector<32xf32> to vector<32x1xf32>
    %cst_50 = arith.constant 1.280000e+02 : f32
    %112 = vector.broadcast %cst_50 : f32 to vector<32x1xf32>
    %113 = arith.divf %111, %112 : vector<32x1xf32>
    %114 = vector.broadcast %106 : vector<32x1xf32> to vector<32x128xf32>
    %115 = arith.subf %102, %114 : vector<32x128xf32>
    %cst_51 = arith.constant 9.99999974E-6 : f32
    %116 = vector.broadcast %cst_51 : f32 to vector<32x1xf32>
    %117 = arith.addf %113, %116 : vector<32x1xf32>
    %118 = math.rsqrt %117 : vector<32x1xf32>
    %119 = vector.broadcast %118 : vector<32x1xf32> to vector<32x128xf32>
    %120 = arith.mulf %115, %119 : vector<32x128xf32>
    %121 = vector.broadcast %2 : vector<1x128xf32> to vector<32x128xf32>
    %122 = arith.mulf %120, %121 : vector<32x128xf32>
    %123 = vector.broadcast %3 : vector<1x128xf32> to vector<32x128xf32>
    %124 = arith.addf %122, %123 : vector<32x128xf32>
    %c0_52 = arith.constant 0 : index
    %c0_53 = arith.constant 0 : index
    %125 = vector.load %arg8[%c0_52, %c0_53] : memref<128x1024xf32, #tpu.memory_space<vmem>>, vector<128x1024xf32>
    %cst_54 = arith.constant dense<0.000000e+00> : vector<32x1024xf32>
    %126 = tpu.matmul %124, %125, %cst_54 {dimension_numbers = #tpu.dot_dimension_numbers<[1], [0], [0], [1], [0, 0, 1, 1], [], []>} : vector<32x128xf32>, vector<128x1024xf32>, vector<32x1024xf32> -> vector<32x1024xf32>
    %127 = vector.broadcast %4 : vector<1x1024xf32> to vector<32x1024xf32>
    %128 = arith.addf %126, %127 : vector<32x1024xf32>
    %129 = vector.extract_strided_slice %128 {offsets = [0, 0], sizes = [32, 512], strides = [1, 1]} : vector<32x1024xf32> to vector<32x512xf32>
    %130 = vector.extract_strided_slice %128 {offsets = [0, 512], sizes = [32, 512], strides = [1, 1]} : vector<32x1024xf32> to vector<32x512xf32>
    %131 = arith.negf %130 : vector<32x512xf32>
    %132 = math.exp %131 : vector<32x512xf32>
    %cst_55 = arith.constant 1.000000e+00 : f32
    %133 = vector.broadcast %cst_55 : f32 to vector<32x512xf32>
    %134 = arith.addf %133, %132 : vector<32x512xf32>
    %135 = arith.divf %133, %134 : vector<32x512xf32>
    %136 = arith.mulf %130, %135 : vector<32x512xf32>
    %137 = arith.mulf %129, %136 : vector<32x512xf32>
    %c0_56 = arith.constant 0 : index
    %c0_57 = arith.constant 0 : index
    %138 = vector.load %arg10[%c0_56, %c0_57] : memref<512x128xf32, #tpu.memory_space<vmem>>, vector<512x128xf32>
    %cst_58 = arith.constant dense<0.000000e+00> : vector<32x128xf32>
    %139 = tpu.matmul %137, %138, %cst_58 {dimension_numbers = #tpu.dot_dimension_numbers<[1], [0], [0], [1], [0, 0, 1, 1], [], []>} : vector<32x512xf32>, vector<512x128xf32>, vector<32x128xf32> -> vector<32x128xf32>
    %140 = vector.broadcast %5 : vector<1x128xf32> to vector<32x128xf32>
    %141 = arith.addf %139, %140 : vector<32x128xf32>
    %142 = arith.addf %102, %141 : vector<32x128xf32>
    %c0_59 = arith.constant 0 : index
    %c0_60 = arith.constant 0 : index
    %143 = vector.load %arg12[%c0_59, %c0_60] : memref<32x128xf32, #tpu.memory_space<vmem>>, vector<32x128xf32>
    tpu.vector_store %arg12[%c0_59, %c0_60], %142 {strides = array<i32>} : memref<32x128xf32, #tpu.memory_space<vmem>>, vector<32x128xf32>,
    return
  }
  func.func @transform_0(%arg0: i32) -> (i32, i32) {
    %c0_i32 = arith.constant 0 : i32
    %c0_i32_0 = arith.constant 0 : i32
    return %arg0, %c0_i32 : i32, i32
  }
  func.func @transform_1(%arg0: i32) -> (i32, i32) {
    %c0_i32 = arith.constant 0 : i32
    %c0_i32_0 = arith.constant 0 : i32
    %c0_i32_1 = arith.constant 0 : i32
    return %c0_i32, %c0_i32_0 : i32, i32
  }
  func.func @transform_2(%arg0: i32) -> (i32, i32) {
    %c0_i32 = arith.constant 0 : i32
    %c0_i32_0 = arith.constant 0 : i32
    %c0_i32_1 = arith.constant 0 : i32
    return %c0_i32, %c0_i32_0 : i32, i32
  }
  func.func @transform_3(%arg0: i32) -> (i32, i32) {
    %c0_i32 = arith.constant 0 : i32
    %c0_i32_0 = arith.constant 0 : i32
    %c0_i32_1 = arith.constant 0 : i32
    return %c0_i32, %c0_i32_0 : i32, i32
  }
  func.func @transform_4(%arg0: i32) -> (i32, i32) {
    %c0_i32 = arith.constant 0 : i32
    %c0_i32_0 = arith.constant 0 : i32
    %c0_i32_1 = arith.constant 0 : i32
    return %c0_i32, %c0_i32_0 : i32, i32
  }
  func.func @transform_5(%arg0: i32) -> (i32, i32) {
    %c0_i32 = arith.constant 0 : i32
    %c0_i32_0 = arith.constant 0 : i32
    %c0_i32_1 = arith.constant 0 : i32
    return %c0_i32, %c0_i32_0 : i32, i32
  }
  func.func @transform_6(%arg0: i32) -> (i32, i32) {
    %c0_i32 = arith.constant 0 : i32
    %c0_i32_0 = arith.constant 0 : i32
    %c0_i32_1 = arith.constant 0 : i32
    return %c0_i32, %c0_i32_0 : i32, i32
  }
  func.func @transform_7(%arg0: i32) -> (i32, i32) {
    %c0_i32 = arith.constant 0 : i32
    %c0_i32_0 = arith.constant 0 : i32
    %c0_i32_1 = arith.constant 0 : i32
    return %c0_i32, %c0_i32_0 : i32, i32
  }
  func.func @transform_8(%arg0: i32) -> (i32, i32) {
    %c0_i32 = arith.constant 0 : i32
    %c0_i32_0 = arith.constant 0 : i32
    %c0_i32_1 = arith.constant 0 : i32
    return %c0_i32, %c0_i32_0 : i32, i32
  }
  func.func @transform_9(%arg0: i32) -> (i32, i32) {
    %c0_i32 = arith.constant 0 : i32
    %c0_i32_0 = arith.constant 0 : i32
    %c0_i32_1 = arith.constant 0 : i32
    return %c0_i32, %c0_i32_0 : i32, i32
  }
  func.func @transform_10(%arg0: i32) -> (i32, i32) {
    %c0_i32 = arith.constant 0 : i32
    %c0_i32_0 = arith.constant 0 : i32
    %c0_i32_1 = arith.constant 0 : i32
    return %c0_i32, %c0_i32_0 : i32, i32
  }
  func.func @transform_11(%arg0: i32) -> (i32, i32) {
    %c0_i32 = arith.constant 0 : i32
    %c0_i32_0 = arith.constant 0 : i32
    return %arg0, %c0_i32 : i32, i32
  }
}

</mosaic_0001>

<bundles_post_ra>
// kernel: tpu_custom_call.1
= control target key start
LH: loop header
LB: loop body
LE: loop exit
PB: predicated region body
PF: predicated region fallthrough
CT: control target
= control target key end

     0   :  { %16 = vsyncpa [#allocation3], 0  ;;  %s4203_s0 = inlined_call_operand.hbm [shape: f32[32,128], index: 0, kind: input, shape index: {}]   ;;  %s4204_s1 = inlined_call_operand.vmem [shape: f32[1,128], index: 1, kind: input, shape index: {}]   ;;  %s4205_s2 = inlined_call_operand.vmem [shape: f32[1,128], index: 2, kind: input, shape index: {}]   ;;  %s4206_s3 = inlined_call_operand.hbm [shape: f32[128,384], index: 3, kind: input, shape index: {}]   ;;  %s4207_s4 = inlined_call_operand.hbm [shape: f32[128,128], index: 4, kind: input, shape index: {}]   ;;  %s4208_s5 = inlined_call_operand.vmem [shape: f32[1,128], index: 5, kind: input, shape index: {}]   ;;  %s4209_s6 = inlined_call_operand.vmem [shape: f32[1,128], index: 6, kind: input, shape index: {}]   ;;  %s4210_s7 = inlined_call_operand.hbm [shape: f32[128,1024], index: 7, kind: input, shape index: {}]   ;;  %s4211_s8 = inlined_call_operand.vmem [shape: f32[1,1024], index: 8, kind: input, shape index: {}]   ;;  %s4212_s9 = inlined_call_operand.hbm [shape: f32[512,128], index: 9, kind: input, shape index: {}]   ;;  %s4213_s10 = inlined_call_operand.vmem [shape: f32[1,128], index: 10, kind: input, shape index: {}]   ;;  %s4214_s11 = inlined_call_operand.hbm [shape: f32[32,128], index: 11, kind: output, shape index: {}]  }
   0x1   :  { %17 = vsyncpa [#allocation6], 0 }
   0x2   :  { %18 = vsyncpa [#allocation9], 0 }
   0x3   :  { %19 = vsyncpa [#allocation4], 0  ;;  %s3572_s17 = smov [#allocation5]   ;;  %s3432_s21 = scalar_lea.hbm %s4206_s3, 6144 }
   0x4   :  { %s41_s18 = sshll.u32 %s3572_s17, 4  ;;  %p3433_p0 = scmp.ne.s32.totalorder %s4206_s3, %s3432_s21  ;;  %s42_s18 = int_to_ptr.vmem [resolvable:$true] %s41_s18 }
   0x5   :  { %p3436_p1 = scmp.lt.u32.totalorder %s3432_s21, %s4206_s3 }
   0x7   :  { %p3438_p2 = pnand %p3436_p1, %p3433_p0 }
   0x9   :  { %3441 = shalt.err (!%p3438_p2)
}
   0xa   :  { %s3442_s26 = scalar_lea.vmem %s42_s18, 6144  ;;  %p3447_p4 = scmp.lt.s32.totalorder %s42_s18, %s42_s18 }
   0xb   :  { %p3443_p3 = scmp.ne.s32.totalorder %s42_s18, %s3442_s26  ;;  %p3448_p5 = scmp.lt.s32.totalorder %s3442_s26, %s3442_s26 }
   0xd   :  { %p3449_p6 = por %p3448_p5, %p3447_p4 }
   0xf   :  { %p3450_p7 = pnand %p3449_p6, %p3443_p3 }
  0x11   :  { %3453 = shalt.err (!%p3450_p7)
}
  0x12   :  { %s3573_s27 = smov 384   ;;  %s3574_s28 = smov 24  }
  0x13   :  { %47 = dma.hbm_to_vmem [thread:$0]  %s4206_s3, 6144, %s42_s18, [#allocation6], %s3573_s27, %s3573_s27, %s3574_s28  }
  0x14   :  { %s3575_s12 = smov [#allocation8]   ;;  %s3454_s16 = scalar_lea.hbm %s4210_s7, 16384 }
  0x15   :  { %s69_s13 = sshll.u32 %s3575_s12, 4  ;;  %p3455_p8 = scmp.ne.s32.totalorder %s4210_s7, %s3454_s16  ;;  %s70_s13 = int_to_ptr.vmem [resolvable:$true] %s69_s13 }
  0x16   :  { %p3458_p9 = scmp.lt.u32.totalorder %s3454_s16, %s4210_s7 }
  0x18   :  { %p3460_p10 = pnand %p3458_p9, %p3455_p8 }
  0x1a   :  { %3463 = shalt.err (!%p3460_p10)
}
  0x1b   :  { %s3464_s22 = scalar_lea.vmem %s70_s13, 16384  ;;  %p3469_p12 = scmp.lt.s32.totalorder %s70_s13, %s70_s13 }
  0x1c   :  { %p3465_p11 = scmp.ne.s32.totalorder %s70_s13, %s3464_s22  ;;  %p3470_p13 = scmp.lt.s32.totalorder %s3464_s22, %s3464_s22 }
  0x1e   :  { %p3471_p0 = por %p3470_p13, %p3469_p12 }
  0x20   :  { %p3472_p1 = pnand %p3471_p0, %p3465_p11 }
  0x22   :  { %3475 = shalt.err (!%p3472_p1)
}
  0x23   :  { %s3576_s3 = smov 1024   ;;  %s3577_s18 = smov 64  }
  0x24   :  { %75 = dma.hbm_to_vmem [thread:$0]  %s4210_s7, 16384, %s70_s13, [#allocation9], %s3576_s3, %s3576_s3, %s3577_s18  }
  0x25   :  { %s3578_s25 = smov [#allocation2]   ;;  %s3476_s29 = scalar_lea.hbm %s4203_s0, 512 }
  0x26   :  { %s25_s26 = sshll.u32 %s3578_s25, 4  ;;  %p3477_p2 = scmp.ne.s32.totalorder %s4203_s0, %s3476_s29  ;;  %s26_s26 = int_to_ptr.vmem [resolvable:$true] %s25_s26 }
  0x27   :  { %p3480_p3 = scmp.lt.u32.totalorder %s3476_s29, %s4203_s0 }
  0x29   :  { %p3482_p4 = pnand %p3480_p3, %p3477_p2 }
  0x2b   :  { %3485 = shalt.err (!%p3482_p4)
}
  0x2c   :  { %s3486_s16 = scalar_lea.vmem %s26_s26, 512  ;;  %p3491_p6 = scmp.lt.s32.totalorder %s26_s26, %s26_s26 }
  0x2d   :  { %p3487_p5 = scmp.ne.s32.totalorder %s26_s26, %s3486_s16  ;;  %p3492_p7 = scmp.lt.s32.totalorder %s3486_s16, %s3486_s16 }
  0x2f   :  { %p3493_p8 = por %p3492_p7, %p3491_p6 }
  0x31   :  { %p3494_p9 = pnand %p3493_p8, %p3487_p5 }
  0x33   :  { %3497 = shalt.err (!%p3494_p9)
}
  0x34   :  { %s3579_s7 = smov 128   ;;  %s3580_s13 = smov 8  }
  0x35   :  { %31 = dma.hbm_to_vmem [thread:$0]  %s4203_s0, 512, %s26_s26, [#allocation3], %s3579_s7, %s3579_s7, %s3580_s13  }
  0x36   :  { %s3581_s20 = smov [#allocation7]   ;;  %s3582_s22 = smov [#allocation10]  }
  0x37   :  { %s53_s21 = sshll.u32 %s3581_s20, 4  ;;  %s83_s3 = sshll.u32 %s3582_s22, 4  ;;  %s54_s21 = int_to_ptr.vmem [resolvable:$true] %s53_s21  ;;  %s84_s3 = int_to_ptr.vmem [resolvable:$true] %s83_s3 }
  0x38   :  { %s3498_s25 = scalar_lea.hbm %s4207_s4, 2048 }
  0x39   :  { %p3499_p10 = scmp.ne.s32.totalorder %s4207_s4, %s3498_s25  ;;  %p3502_p11 = scmp.lt.u32.totalorder %s3498_s25, %s4207_s4 }
  0x3b   :  { %p3504_p12 = pnand %p3502_p11, %p3499_p10 }
  0x3d   :  { %3507 = shalt.err (!%p3504_p12)
}
  0x3e   :  { %s3508_s0 = scalar_lea.vmem %s54_s21, 2048  ;;  %p3513_p0 = scmp.lt.s32.totalorder %s54_s21, %s54_s21 }
  0x3f   :  { %p3509_p13 = scmp.ne.s32.totalorder %s54_s21, %s3508_s0  ;;  %p3514_p1 = scmp.lt.s32.totalorder %s3508_s0, %s3508_s0 }
  0x41   :  { %p3515_p2 = por %p3514_p1, %p3513_p0 }
  0x43   :  { %p3516_p3 = pnand %p3515_p2, %p3509_p13 }
  0x45   :  { %3519 = shalt.err (!%p3516_p3)
}
  0x46   :  { %59 = dma.hbm_to_vmem [thread:$0]  %s4207_s4, 2048, %s54_s21, [#allocation6], %s3579_s7, %s3579_s7, %s3580_s13  }
  0x47   :  { %s3520_s16 = scalar_lea.hbm %s4212_s9, 8192 }
  0x48   :  { %p3521_p4 = scmp.ne.s32.totalorder %s4212_s9, %s3520_s16  ;;  %p3524_p5 = scmp.lt.u32.totalorder %s3520_s16, %s4212_s9 }
  0x4a   :  { %p3526_p6 = pnand %p3524_p5, %p3521_p4 }
  0x4c   :  { %3529 = shalt.err (!%p3526_p6)
}
  0x4d   :  { %s3530_s23 = scalar_lea.vmem %s84_s3, 8192  ;;  %p3535_p8 = scmp.lt.s32.totalorder %s84_s3, %s84_s3 }
  0x4e   :  { %p3531_p7 = scmp.ne.s32.totalorder %s84_s3, %s3530_s23  ;;  %p3536_p9 = scmp.lt.s32.totalorder %s3530_s23, %s3530_s23 }
  0x50   :  { %p3537_p10 = por %p3536_p9, %p3535_p8 }
  0x52   :  { %p3538_p11 = pnand %p3537_p10, %p3531_p7 }
  0x54   :  { %3541 = shalt.err (!%p3538_p11)
}
  0x55   :  { %89 = dma.hbm_to_vmem [thread:$0]  %s4212_s9, 8192, %s84_s3, [#allocation9], %s3579_s7, %s3579_s7, %s3580_s13  }
  0x56   :  { %3564 = dma.done.wait [#allocation3], 512  }
  0x57   :  { %3565 = vsyncadd [#allocation3], 4294966784 }
  0x58   :  { %3566 = dma.done.wait [#allocation6], 8192  }
  0x59   :  { %3567 = vsyncadd [#allocation6], 4294959104 }
  0x5a   :  { %3568 = dma.done.wait [#allocation9], 24576  }
  0x5b   :  { %3569 = vsyncadd [#allocation9], 4294942720  ;;  %v3715_v0 = vld [vmem:[#allocation2] sm:$0xff]  ;;  %v3718_v1 = vld [vmem:[#allocation2 + $0x8] sm:$0xff]  ;;  %vm404_vm0 = vcmask 523264   ;;  %vm492_vm2 = vcmask 130048  }
  0x5c   :  { %117 = vadd.xlane.f32.xlu0 %v3715_v0  ;;  %v3721_v2 = vld [vmem:[#allocation2 + $0x10] sm:$0xff]  ;;  %v183_v3 = vld [vmem:[#allocation5 + $0x8] sm:$0xff]  ;;  %v186_v4 = vld [vmem:[#allocation5 + $0x20] sm:$0xff] }
  0x5d   :  { %v182_v5 = vld [vmem:[#allocation5] sm:$0xff]  ;;  %v2921_v6 = vpack.c.bf16 %v186_v4, %v183_v3  ;;  %v185_v7 = vld [vmem:[#allocation5 + $0x18] sm:$0xff]  ;;  %v192_v9 = vld [vmem:[#allocation5 + $0x50] sm:$0xff] }
  0x5e   :  { %v189_v8 = vld [vmem:[#allocation5 + $0x38] sm:$0xff]  ;;  %v2923_v10 = vpack.c.bf16 %v185_v7, %v182_v5  ;;  %v184_v12 = vld [vmem:[#allocation5 + $0x10] sm:$0xff]  ;;  %v187_v13 = vld [vmem:[#allocation5 + $0x28] sm:$0xff] }
  0x5f   :  { %v2925_v11 = vpack.c.bf16 %v192_v9, %v189_v8  ;;  %v188_v14 = vld [vmem:[#allocation5 + $0x30] sm:$0xff]  ;;  %2922 = vmatprep.subr.bf16.mxu0 %v2921_v6  ;;  %v2953_v15 = vpack.c.bf16 %v187_v13, %v184_v12  ;;  %v191_v16 = vld [vmem:[#allocation5 + $0x48] sm:$0xff]  ;;  %v198_v18 = vld [vmem:[#allocation5 + $0x80] sm:$0xff]  ;;  %v3583_v9 = vmov 0.0  }
  0x60   :  { %119 = vadd.xlane.f32.xlu0 %v3718_v1  ;;  %v195_v17 = vld [vmem:[#allocation5 + $0x68] sm:$0xff]  ;;  %2924 = vmatpush1.bf16.msra.mxu0 %v2923_v10  ;;  %v2927_v19 = vpack.c.bf16 %v191_v16, %v188_v14  ;;  %v190_v20 = vld [vmem:[#allocation5 + $0x40] sm:$0xff]  ;;  %v193_v21 = vld [vmem:[#allocation5 + $0x58] sm:$0xff] }
  0x61   :  { %2926 = vmatprep.subr.bf16.mxu0 %v2925_v11  ;;  %2954 = vmatprep.subr.bf16.mxu1 %v2953_v15  ;;  %v2929_v22 = vpack.c.bf16 %v198_v18, %v195_v17  ;;  %v2957_v23 = vpack.c.bf16 %v193_v21, %v190_v20  ;;  %v194_v24 = vld [vmem:[#allocation5 + $0x60] sm:$0xff]  ;;  %v197_v25 = vld [vmem:[#allocation5 + $0x78] sm:$0xff]  ;;  %v204_v37 = vld [vmem:[#allocation5 + $0xb0] sm:$0xff] }
  0x62   :  { %2956 = vmatpush3.bf16.msra.mxu1 %v2953_v15  ;;  %v2931_v26 = vpack.c.bf16 %v197_v25, %v194_v24  ;;  %v3734_v35 = vld [vmem:[#allocation2 + $0x18] sm:$0xff]  ;;  %v196_v38 = vld [vmem:[#allocation5 + $0x70] sm:$0xff]  ;;  %v199_v40 = vld [vmem:[#allocation5 + $0x88] sm:$0xff]  ;;  %294 = vmatprep.mubr.f32.mxu0 %v3583_v9 }
  0x63   :  { %2958 = vmatprep.subr.bf16.mxu1 %v2957_v23  ;;  %v201_v36 = vld [vmem:[#allocation5 + $0x98] sm:$0xff]  ;;  %v200_v41 = vld [vmem:[#allocation5 + $0x90] sm:$0xff]  ;;  %v203_v42 = vld [vmem:[#allocation5 + $0xa8] sm:$0xff]  ;;  %v2961_v43 = vpack.c.bf16 %v199_v40, %v196_v38 }
  0x64   :  { %121 = vadd.xlane.f32.xlu0 %v3721_v2  ;;  %2928 = vmatpush1.bf16.msra.mxu0 %v2927_v19  ;;  %v2933_v39 = vpack.c.bf16 %v204_v37, %v201_v36  ;;  %v2935_v44 = vpack.c.bf16 %v203_v42, %v200_v41  ;;  %v207_v45 = vld [vmem:[#allocation5 + $0xc8] sm:$0xff]  ;;  %v210_v46 = vld [vmem:[#allocation5 + $0xe0] sm:$0xff]  ;;  %v205_v49 = vld [vmem:[#allocation5 + $0xb8] sm:$0xff] }
  0x65   :  { %2930 = vmatprep.subr.bf16.mxu0 %v2929_v22  ;;  %v202_v47 = vld [vmem:[#allocation5 + $0xa0] sm:$0xff]  ;;  %v2937_v48 = vpack.c.bf16 %v210_v46, %v207_v45  ;;  %v209_v51 = vld [vmem:[#allocation5 + $0xd8] sm:$0xff]  ;;  %v216_v55 = vld [vmem:[#allocation5 + $0x110] sm:$0xff] }
  0x66   :  { %2960 = vmatpush3.bf16.msra.mxu1 %v2957_v23  ;;  %v206_v50 = vld [vmem:[#allocation5 + $0xc0] sm:$0xff]  ;;  %v2965_v52 = vpack.c.bf16 %v205_v49, %v202_v47  ;;  %v213_v54 = vld [vmem:[#allocation5 + $0xf8] sm:$0xff]  ;;  %v208_v56 = vld [vmem:[#allocation5 + $0xd0] sm:$0xff] }
  0x67   :  { %2962 = vmatprep.subr.bf16.mxu1 %v2961_v43  ;;  %v2939_v53 = vpack.c.bf16 %v209_v51, %v206_v50  ;;  %v2941_v57 = vpack.c.bf16 %v216_v55, %v213_v54  ;;  %v211_v58 = vld [vmem:[#allocation5 + $0xe8] sm:$0xff]  ;;  %v212_v59 = vld [vmem:[#allocation5 + $0xf0] sm:$0xff]  ;;  %v222_v3 = vld [vmem:[#allocation5 + $0x140] sm:$0xff] }
  0x68   :  { %2932 = vmatpush1.bf16.msra.mxu0 %v2931_v26  ;;  %v215_v60 = vld [vmem:[#allocation5 + $0x108] sm:$0xff]  ;;  %v2969_v61 = vpack.c.bf16 %v211_v58, %v208_v56  ;;  %v214_v4 = vld [vmem:[#allocation5 + $0x100] sm:$0xff]  ;;  %v217_v6 = vld [vmem:[#allocation5 + $0x118] sm:$0xff] }
  0x69   :  { %2934 = vmatprep.subr.bf16.mxu0 %v2933_v39  ;;  %v2943_v62 = vpack.c.bf16 %v215_v60, %v212_v59  ;;  %v219_v63 = vld [vmem:[#allocation5 + $0x128] sm:$0xff]  ;;  %v218_v7 = vld [vmem:[#allocation5 + $0x120] sm:$0xff]  ;;  %v221_v8 = vld [vmem:[#allocation5 + $0x138] sm:$0xff]  ;;  %v2973_v10 = vpack.c.bf16 %v217_v6, %v214_v4 }
  0x6a   :  { %2964 = vmatpush3.bf16.msra.mxu1 %v2961_v43  ;;  %v2945_v5 = vpack.c.bf16 %v222_v3, %v219_v63  ;;  %v2947_v11 = vpack.c.bf16 %v221_v8, %v218_v7  ;;  %v225_v12 = vld [vmem:[#allocation5 + $0x158] sm:$0xff]  ;;  %v228_v13 = vld [vmem:[#allocation5 + $0x170] sm:$0xff]  ;;  %v223_v16 = vld [vmem:[#allocation5 + $0x148] sm:$0xff] }
  0x6b   :  { %2966 = vmatprep.subr.bf16.mxu1 %v2965_v52  ;;  %v220_v14 = vld [vmem:[#allocation5 + $0x130] sm:$0xff]  ;;  %v2949_v15 = vpack.c.bf16 %v228_v13, %v225_v12  ;;  %v227_v18 = vld [vmem:[#allocation5 + $0x168] sm:$0xff]  ;;  %v226_v21 = vld [vmem:[#allocation5 + $0x160] sm:$0xff] }
  0x6c   :  { %2936 = vmatpush1.bf16.msra.mxu0 %v2935_v44  ;;  %v224_v17 = vld [vmem:[#allocation5 + $0x150] sm:$0xff]  ;;  %v2977_v19 = vpack.c.bf16 %v223_v16, %v220_v14  ;;  %v229_v22 = vld [vmem:[#allocation5 + $0x178] sm:$0xff]  ;;  %v2519_v43 = vld [vmem:[%s4205_s2] ss:$0 sm:$0xff] }
  0x6d   :  { %2938 = vmatprep.subr.bf16.mxu0 %v2937_v48  ;;  %v2951_v20 = vpack.c.bf16 %v227_v18, %v224_v17  ;;  %v2981_v23 = vpack.c.bf16 %v229_v22, %v226_v21  ;;  %vm3760_vm1 = vmpackc.low %vm404_vm0, %vm404_vm0 }
  0x6e   :  { %2968 = vmatpush3.bf16.msra.mxu1 %v2965_v52 }
  0x6f   :  { %2970 = vmatprep.subr.bf16.mxu1 %v2969_v61 }
  0x70   :  { %2940 = vmatpush1.bf16.msra.mxu0 %v2939_v53 }
  0x71   :  { %2942 = vmatprep.subr.bf16.mxu0 %v2941_v57 }
  0x72   :  { %2972 = vmatpush3.bf16.msra.mxu1 %v2969_v61 }
  0x73   :  { %2974 = vmatprep.subr.bf16.mxu1 %v2973_v10 }
  0x74   :  { %2944 = vmatpush1.bf16.msra.mxu0 %v2943_v62 }
  0x75   :  { %2946 = vmatprep.subr.bf16.mxu0 %v2945_v5 }
  0x76   :  { %2976 = vmatpush3.bf16.msra.mxu1 %v2973_v10 }
  0x77   :  { %2978 = vmatprep.subr.bf16.mxu1 %v2977_v19 }
  0x78   :  { %2948 = vmatpush1.bf16.msra.mxu0 %v2947_v11 }
  0x79   :  { %2950 = vmatprep.subr.bf16.mxu0 %v2949_v15 }
  0x7a   :  { %2980 = vmatpush3.bf16.msra.mxu1 %v2977_v19 }
  0x7b   :  { %2982 = vmatprep.subr.bf16.mxu1 %v2981_v23 }
  0x7c   :  { %2952 = vmatpush1.bf16.msra.mxu0 %v2951_v20 }
  0x7e   :  { %2984 = vmatpush3.bf16.msra.mxu1 %v2981_v23 }
  0xe9   :  { %v118_v27 = vpop.xlane.xlu0 %117 }
  0xea   :  { %v126_v28 = vmul.f32 0.0078125, %v118_v27 }
  0xec   :  { %v3725_v29 = vsub.f32 %v3715_v0, %v126_v28 }
  0xed   :  { %v120_v30 = vpop.xlane.xlu0 %119 }
  0xee   :  { %v127_v31 = vmul.f32 0.0078125, %v120_v30  ;;  %v134_v32 = vmul.f32 %v3725_v29, %v3725_v29 }
  0xf0   :  { %v3730_v33 = vsub.f32 %v3718_v1, %v127_v31  ;;  %138 = vadd.xlane.f32.xlu1 %v134_v32 }
  0xf1   :  { %v122_v24 = vpop.xlane.xlu0 %121 }
  0xf2   :  { %v135_v34 = vmul.f32 %v3730_v33, %v3730_v33  ;;  %v128_v25 = vmul.f32 0.0078125, %v122_v24 }
  0xf4   :  { %140 = vadd.xlane.f32.xlu1 %v135_v34  ;;  %v132_v26 = vsub.f32 %v3721_v2, %v128_v25  ;;  %v2518_v2 = vld [vmem:[%s4204_s1] ss:$0 sm:$0xff] }
  0xf6   :  { %v136_v27 = vmul.f32 %v132_v26, %v132_v26 }
  0xf8   :  { %123 = vadd.xlane.f32.xlu1 %v3734_v35  ;;  %142 = vadd.xlane.f32.xlu0 %v136_v27 }
 0x17d   :  { %v139_v28 = vpop.xlane.xlu1 %138 }
 0x17e   :  { %v146_v30 = vmul.f32 0.0078125, %v139_v28 }
 0x180   :  { %v150_v31 = vadd.f32 1e-05, %v146_v30 }
 0x181   :  { %v141_v32 = vpop.xlane.xlu1 %140 }
 0x182   :  { %3318 = vrsqrt.f32 %v150_v31  ;;  %v147_v34 = vmul.f32 0.0078125, %v141_v32 }
 0x184   :  { %v151_v36 = vadd.f32 1e-05, %v147_v34 }
 0x185   :  { %v124_v37 = vpop.xlane.xlu1 %123 }
 0x186   :  { %3320 = vrsqrt.f32 %v151_v36  ;;  %v129_v38 = vmul.f32 0.0078125, %v124_v37 }
 0x188   :  { %v133_v39 = vsub.f32 %v3734_v35, %v129_v38 }
 0x18a   :  { %v137_v40 = vmul.f32 %v133_v39, %v133_v39 }
 0x18c   :  { %v3319_v41 = vpop.eup %3318  ;;  %144 = vadd.xlane.f32.xlu1 %v137_v40 }
 0x18d   :  { %v158_v42 = vmul.f32 %v3319_v41, %v3725_v29  ;;  %v143_v29 = vpop.xlane.xlu0 %142 }
 0x18e   :  { %v148_v49 = vmul.f32 0.0078125, %v143_v29 }
 0x18f   :  { %v168_v44 = vmul.f32 %v2518_v2, %v158_v42 }
 0x190   :  { %v3321_v45 = vpop.eup %3320  ;;  %v152_v50 = vadd.f32 1e-05, %v148_v49 }
 0x191   :  { %v178_v46 = vadd.f32 %v2519_v43, %v168_v44  ;;  %v159_v47 = vmul.f32 %v3321_v45, %v3730_v33 }
 0x192   :  { %3322 = vrsqrt.f32 %v152_v50 }
 0x193   :  { %295 = vmatmul.mubr.f32.vlgmr.msra.gmra.mrb[0].mxu0 %v178_v46  ;;  %2783 = vmatprep.mubr.f32.mxu1 %v178_v46  ;;  %v169_v35 = vmul.f32 %v2518_v2, %v159_v47 }
 0x194   :  { %300 = vmatprep.mubr.f32.mxu0 %v3583_v9 }
 0x195   :  { %v179_v48 = vadd.f32 %v2519_v43, %v169_v35 }
 0x197   :  { %301 = vmatmul.mubr.f32.gmra.mrb[2].mxu0 %v179_v48  ;;  %2784 = vmatmul.mubr.f32.vlgmr.msra.gmra.mrb[0].mxu1 %v179_v48 }
 0x198   :  { %306 = vmatprep.mubr.f32.mxu0 %v3583_v9 }
 0x19c   :  { %v3323_v51 = vpop.eup %3322 }
 0x19d   :  { %v160_v52 = vmul.f32 %v3323_v51, %v132_v26 }
 0x19f   :  { %v170_v53 = vmul.f32 %v2518_v2, %v160_v52 }
 0x1a1   :  { %v180_v54 = vadd.f32 %v2519_v43, %v170_v53 }
 0x1a3   :  { %307 = vmatmul.mubr.f32.gmra.mrb[4].mxu0 %v180_v54  ;;  %2786 = vmatprep.mubr.f32.mxu1 %v180_v54 }
 0x1a4   :  { %312 = vmatprep.mubr.f32.mxu0 %v3583_v9 }
 0x219   :  { %v145_v33 = vpop.xlane.xlu1 %144 }
 0x21a   :  { %v149_v55 = vmul.f32 0.0078125, %v145_v33 }
 0x21c   :  { %v153_v56 = vadd.f32 1e-05, %v149_v55 }
 0x21e   :  { %3324 = vrsqrt.f32 %v153_v56 }
 0x228   :  { %v3325_v57 = vpop.eup %3324 }
 0x229   :  { %v161_v58 = vmul.f32 %v3325_v57, %v133_v39 }
 0x22b   :  { %v171_v59 = vmul.f32 %v2518_v2, %v161_v58 }
 0x22d   :  { %v181_v60 = vadd.f32 %v2519_v43, %v171_v59 }
 0x22f   :  { %313 = vmatmul.mubr.f32.gmra.mrb[6].mxu0 %v181_v60  ;;  %2787 = vmatmul.mubr.f32.gmra.mrb[2].mxu1 %v181_v60  ;;  %v806_v60 = vld [vmem:[#allocation7 + $0x40] sm:$0xff] }
 0x266   :  { %v296_v61 = vpop.f32.mrb[0].mxu0 }
 0x267   :  { %604 = vrot.lane.b32.xlu1 %v296_v61, %s3577_s18  ;;  %v298_v62 = vpop.f32.mrb[1].mxu0  ;;  %2793 = vmatprep.mubr.msk.f32.mxu1 %vm404_vm0, %v296_v61  ;;  %v807_v61 = vld [vmem:[#allocation7 + $0x48] sm:$0xff] }
 0x26a   :  { %v302_v63 = vpop.f32.mrb[2].mxu0  ;;  %v3753_v3 = vpop.f32.mrb[0].mxu1 }
 0x26b   :  { %v3755_v4 = vpop.f32.mrb[1].mxu1  ;;  %606 = vrot.lane.b32.xlu1 %v302_v63, %s3577_s18  ;;  %v304_v5 = vpop.f32.mrb[3].mxu0 }
 0x26c   :  { %v2991_v7 = vpack.c.bf16 %v3753_v3, %v3755_v4  ;;  %v2985_v8 = vpack.c.bf16 %v304_v5, %v298_v62  ;;  %v3298_v10 = vpack.i.bf16 %v304_v5, %v298_v62  ;;  %v3303_v11 = vpack.i.bf16 %v3753_v3, %v3755_v4 }
 0x26d   :  { %v3812_v5 = vpack.c.bf16 %v807_v61, %v806_v60 }
 0x26e   :  { %3299 = vrot.lane.b32.xlu0 %v3298_v10, %s3577_s18  ;;  %2987 = vmatprep.subr.msk.bf16.mxu1 %vm3760_vm1, %v2985_v8 }
 0x26f   :  { %2990 = vmatpush3.bf16.xpose.msk.msra.mxu1 %vm3760_vm1, %v2985_v8 }
 0x270   :  { %2992 = vmatprep.subr.bf16.mxu1 %v2991_v7 }
 0x276   :  { %2794 = vmatmul.mubr.msk.f32.vlgmr.msra.gmra.mrb[4].mxu1 %vm404_vm0, %v302_v63  ;;  %v3774_v12 = vpop.f32.mrb[4].mxu0 }
 0x277   :  { %2994 = vmatpush3.bf16.msra.mxu1 %v2991_v7  ;;  %v310_v13 = vpop.f32.mrb[5].mxu0 }
 0x2d9   :  { %v605_v14 = vpop.permute.xlu1 %604 }
 0x2da   :  { %2807 = vmatprep.mubr.msk.f32.mxu0 %vm404_vm0, %v605_v14 }
 0x2dd   :  { %v607_v19 = vpop.permute.xlu1 %606 }
 0x2e0   :  { %v3300_v15 = vpop.permute.xlu0 %3299 }
 0x2e1   :  { %v3302_v16 = vunpack.i.h.bf16 %v3300_v15  ;;  %v3301_v17 = vunpack.i.l.bf16 %v3300_v15  ;;  %v808_v15 = vld [vmem:[#allocation7 + $0x50] sm:$0xff] }
 0x2e3   :  { %v2995_v18 = vpack.c.bf16 %v3302_v16, %v3301_v17  ;;  %v809_v16 = vld [vmem:[#allocation7 + $0x58] sm:$0xff] }
 0x2e5   :  { %2997 = vmatprep.subr.msk.bf16.mxu0 %vm3760_vm1, %v2995_v18 }
 0x2e6   :  { %3000 = vmatpush3.bf16.xpose.msk.msra.mxu0 %vm3760_vm1, %v2995_v18 }
 0x2ed   :  { %2808 = vmatmul.mubr.msk.f32.vlgmr.msra.gmra.mrb[8].mxu0 %vm404_vm0, %v607_v19 }
 0x302   :  { %v3782_v20 = vpop.f32.mrb[6].mxu0  ;;  %v3784_v21 = vpop.f32.mrb[2].mxu1 }
 0x303   :  { %v316_v22 = vpop.f32.mrb[7].mxu0  ;;  %v3786_v23 = vpop.f32.mrb[3].mxu1 }
 0x304   :  { %v3788_v24 = vpack.c.bf16 %v316_v22, %v310_v13  ;;  %v3792_v25 = vpack.c.bf16 %v3784_v21, %v3786_v23  ;;  %v3308_v26 = vpack.i.bf16 %v316_v22, %v310_v13  ;;  %v3313_v27 = vpack.i.bf16 %v3784_v21, %v3786_v23  ;;  %v1630_v21 = vld [vmem:[#allocation8 + $0x100] sm:$0xff] }
 0x305   :  { %v1638_v23 = vld [vmem:[#allocation8 + $0x140] sm:$0xff] }
 0x306   :  { %3044 = vmatprep.subr.bf16.mxu1 %v3792_v25 }
 0x349   :  { %v2795_v28 = vpop.f32.mrb[4].mxu1 }
 0x34a   :  { %v483_v30 = vpop.f32.mrb[5].mxu1  ;;  %v496_v38 = vsel %vm492_vm2, %v2795_v28, -inf }
 0x34b   :  { %v493_v37 = vsel %vm492_vm2, %v483_v30, -inf }
 0x3c0   :  { %v2809_v31 = vpop.f32.mrb[8].mxu0 }
 0x3c1   :  { %v686_v32 = vpop.f32.mrb[9].mxu0  ;;  %v698_v34 = vsel %vm492_vm2, %v2809_v31, -inf }
 0x3c2   :  { %699 = vmax.xlane.f32.xlu0 %v698_v34  ;;  %v695_v36 = vsel %vm492_vm2, %v686_v32, -inf  ;;  %v812_v34 = vld [vmem:[#allocation7 + $0x70] sm:$0xff] }
 0x3c3   :  { %696 = vmax.xlane.f32.xlu1 %v695_v36  ;;  %v813_v36 = vld [vmem:[#allocation7 + $0x78] sm:$0xff] }
 0x3c6   :  { %494 = vmax.xlane.f32.xlu0 %v493_v37  ;;  %v596_v37 = vld [vmem:[#allocation7] sm:$0xff] }
 0x3ca   :  { %497 = vmax.xlane.f32.xlu0 %v496_v38  ;;  %v597_v38 = vld [vmem:[#allocation7 + $0x8] sm:$0xff] }
 0x44f   :  { %v700_v39 = vpop.xlane.xlu0 %699 }
 0x450   :  { %v702_v40 = vsub.f32 %v2809_v31, %v700_v39  ;;  %v697_v41 = vpop.xlane.xlu1 %696  ;;  %v811_v31 = vld [vmem:[#allocation7 + $0x68] sm:$0xff]  ;;  %v3838_v39 = vpack.c.bf16 %v597_v38, %v596_v37 }
 0x451   :  { %v701_v42 = vsub.f32 %v686_v32, %v697_v41  ;;  %v598_v41 = vld [vmem:[#allocation7 + $0x10] sm:$0xff] }
 0x452   :  { %v705_v2 = vmul.f32 1.442695, %v702_v40 }
 0x453   :  { %v495_v43 = vpop.xlane.xlu0 %494  ;;  %v703_v45 = vmul.f32 1.442695, %v701_v42 }
 0x454   :  { %3326 = vpow2.f32 %v705_v2  ;;  %v499_v44 = vsub.f32 %v483_v30, %v495_v43  ;;  %v810_v30 = vld [vmem:[#allocation7 + $0x60] sm:$0xff]  ;;  %v599_v2 = vld [vmem:[#allocation7 + $0x18] sm:$0xff] }
 0x455   :  { %v3829_v32 = vpack.c.bf16 %v811_v31, %v810_v30 }
 0x456   :  { %v501_v46 = vmul.f32 1.442695, %v499_v44 }
 0x457   :  { %v498_v47 = vpop.xlane.xlu0 %497 }
 0x458   :  { %3328 = vpow2.f32 %v501_v46  ;;  %v500_v35 = vsub.f32 %v2795_v28, %v498_v47  ;;  %v3819_v28 = vpack.c.bf16 %v809_v16, %v808_v15  ;;  %v600_v46 = vld [vmem:[#allocation7 + $0x20] sm:$0xff]  ;;  %v601_v47 = vld [vmem:[#allocation7 + $0x28] sm:$0xff] }
 0x459   :  { %3330 = vpow2.f32 %v703_v45  ;;  %v3841_v45 = vpack.c.bf16 %v599_v2, %v598_v41  ;;  %v1607_v41 = vld [vmem:[#allocation8 + $0x48] sm:$0xff]  ;;  %v1598_v2 = vld [vmem:[#allocation8] sm:$0xff] }
 0x45a   :  { %v503_v48 = vmul.f32 1.442695, %v500_v35  ;;  %v3848_v35 = vpack.c.bf16 %v601_v47, %v600_v46  ;;  %v1623_v46 = vld [vmem:[#allocation8 + $0xc8] sm:$0xff] }
 0x45c   :  { %3332 = vpow2.f32 %v503_v48  ;;  %v602_v48 = vld [vmem:[#allocation7 + $0x30] sm:$0xff] }
 0x45e   :  { %v3327_v29 = vpop.eup %3326 }
 0x45f   :  { %v710_v49 = vsel %vm492_vm2, %v3327_v29, 0.0 }
 0x460   :  { %711 = vadd.xlane.f32.xlu0 %v710_v49 }
 0x462   :  { %v3329_v50 = vpop.eup %3328 }
 0x463   :  { %v505_v51 = vsel %vm492_vm2, %v3329_v50, 0.0  ;;  %v3331_v52 = vpop.eup %3330 }
 0x464   :  { %506 = vadd.xlane.f32.xlu1 %v505_v51  ;;  %v707_v33 = vsel %vm492_vm2, %v3331_v52, 0.0 }
 0x466   :  { %v3333_v53 = vpop.eup %3332 }
 0x467   :  { %v508_v54 = vsel %vm492_vm2, %v3333_v53, 0.0 }
 0x468   :  { %509 = vadd.xlane.f32.xlu0 %v508_v54  ;;  %708 = vadd.xlane.f32.xlu1 %v707_v33 }
 0x479   :  { %3304 = vrot.lane.b32.xlu1 %v3303_v11, %s3577_s18 }
 0x47d   :  { %3309 = vrot.lane.b32.xlu1 %v3308_v26, %s3577_s18 }
 0x481   :  { %1168 = vrot.lane.b32.xlu1 %v3782_v20, %s3577_s18 }
 0x4ed   :  { %v712_v55 = vpop.xlane.xlu0 %711 }
 0x4f1   :  { %v507_v56 = vpop.xlane.xlu1 %506 }
 0x4f2   :  { %3334 = vrcp.f32 %v507_v56 }
 0x4f3   :  { %3336 = vrcp.f32 %v712_v55 }
 0x4f5   :  { %v510_v57 = vpop.xlane.xlu0 %509  ;;  %v709_v58 = vpop.xlane.xlu1 %708 }
 0x4f6   :  { %3338 = vrcp.f32 %v510_v57 }
 0x4f7   :  { %3340 = vrcp.f32 %v709_v58 }
 0x4f9   :  { %v3305_v59 = vpop.permute.xlu1 %3304 }
 0x4fa   :  { %v3307_v62 = vunpack.i.h.bf16 %v3305_v59  ;;  %v3306_v63 = vunpack.i.l.bf16 %v3305_v59 }
 0x4fc   :  { %v3335_v3 = vpop.eup %3334  ;;  %v3001_v4 = vpack.c.bf16 %v3307_v62, %v3306_v63 }
 0x4fd   :  { %v3310_v7 = vpop.permute.xlu1 %3309  ;;  %v513_v8 = vmul.f32 %v3335_v3, %v3329_v50  ;;  %v3337_v10 = vpop.eup %3336 }
 0x4fe   :  { %3002 = vmatprep.subr.bf16.mxu0 %v3001_v4  ;;  %v3312_v11 = vunpack.i.h.bf16 %v3310_v7  ;;  %v3311_v13 = vunpack.i.l.bf16 %v3310_v7  ;;  %v716_v22 = vmul.f32 %v3337_v10, %v3327_v29  ;;  %v603_v29 = vld [vmem:[#allocation7 + $0x38] sm:$0xff] }
 0x4ff   :  { %2800 = vmatprep.mubr.msk.f32.mxu1 %vm492_vm2, %v513_v8  ;;  %3004 = vmatpush3.bf16.msra.mxu0 %v3001_v4  ;;  %v3852_v49 = vpack.c.bf16 %v603_v29, %v602_v48  ;;  %v1614_v29 = vld [vmem:[#allocation8 + $0x80] sm:$0xff] }
 0x500   :  { %v3339_v14 = vpop.eup %3338  ;;  %3006 = vmatprep.subr.bf16.mxu0 %v3812_v5  ;;  %v3816_v26 = vpack.c.bf16 %v3312_v11, %v3311_v13 }
 0x501   :  { %v3341_v17 = vpop.eup %3340  ;;  %v514_v18 = vmul.f32 %v3339_v14, %v3333_v53 }
 0x502   :  { %v715_v19 = vmul.f32 %v3341_v17, %v3331_v52 }
 0x503   :  { %2801 = vmatmul.mubr.msk.f32.vlgmr.msra.gmra.mrb[6].mxu1 %vm492_vm2, %v514_v18 }
 0x504   :  { %2814 = vmatprep.mubr.msk.f32.mxu0 %vm492_vm2, %v715_v19  ;;  %3046 = vmatpush3.bf16.msra.mxu1 %v3792_v25  ;;  %v3833_v25 = vpack.c.bf16 %v813_v36, %v812_v34 }
 0x505   :  { %2815 = vmatmul.mubr.msk.f32.vlgmr.msra.gmra.mrb[10].mxu0 %vm492_vm2, %v716_v22  ;;  %3049 = vmatprep.subr.msk.bf16.mxu1 %vm3760_vm1, %v3816_v26 }
 0x506   :  { %3008 = vmatpush3.bf16.msra.mxu0 %v3812_v5 }
 0x507   :  { %3010 = vmatprep.subr.bf16.mxu0 %v3819_v28 }
 0x50a   :  { %3012 = vmatpush3.bf16.msra.mxu0 %v3819_v28 }
 0x50b   :  { %3014 = vmatprep.subr.bf16.mxu0 %v3829_v32 }
 0x50e   :  { %3016 = vmatpush3.bf16.msra.mxu0 %v3829_v32 }
 0x50f   :  { %3018 = vmatprep.subr.bf16.mxu0 %v3833_v25 }
 0x512   :  { %3020 = vmatpush3.bf16.msra.mxu0 %v3833_v25 }
 0x513   :  { %3022 = vmatprep.subr.bf16.mxu0 %v3838_v39 }
 0x5d6   :  { %v2802_v40 = vpop.f32.mrb[6].mxu1 }
 0x5d7   :  { %v587_v42 = vpop.f32.mrb[7].mxu1 }
 0x5d8   :  { %v2816_v43 = vpop.f32.mrb[10].mxu0 }
 0x5d9   :  { %v797_v44 = vpop.f32.mrb[11].mxu0 }
 0x5da   :  { %2833 = vmatprep.mubr.msk.f32.mxu0 %vm404_vm0, %v797_v44  ;;  %v1615_v44 = vld [vmem:[#allocation8 + $0x88] sm:$0xff] }
 0x5db   :  { %2834 = vmatmul.mubr.msk.f32.vlgmr.msra.gmra.mrb[12].mxu0 %vm404_vm0, %v2816_v43  ;;  %v1606_v43 = vld [vmem:[#allocation8 + $0x40] sm:$0xff]  ;;  %v3093_v48 = vpack.c.bf16 %v1623_v46, %v1615_v44 }
 0x5dc   :  { %3024 = vmatpush3.bf16.msra.mxu0 %v3838_v39  ;;  %2852 = vmatprep.mubr.msk.f32.mxu0 %vm404_vm0, %v587_v42  ;;  %v3091_v47 = vpack.c.bf16 %v1606_v43, %v1598_v2 }
 0x5dd   :  { %3026 = vmatprep.subr.bf16.mxu0 %v3841_v45 }
 0x5e0   :  { %3028 = vmatpush3.bf16.msra.mxu0 %v3841_v45 }
 0x5e1   :  { %3030 = vmatprep.subr.bf16.mxu0 %v3848_v35 }
 0x5e4   :  { %3032 = vmatpush3.bf16.msra.mxu0 %v3848_v35 }
 0x5e5   :  { %3034 = vmatprep.subr.bf16.mxu0 %v3852_v49 }
 0x5e8   :  { %3036 = vmatpush3.bf16.msra.mxu0 %v3852_v49 }
 0x5e9   :  { %3039 = vmatprep.subr.msk.bf16.mxu0 %vm3760_vm1, %v3788_v24 }
 0x5eb   :  { %2853 = vmatmul.mubr.msk.f32.vlgmr.msra.gmra.mrb[12].mxu0 %vm404_vm0, %v2802_v40  ;;  %v1599_v40 = vld [vmem:[#allocation8 + $0x8] sm:$0xff] }
 0x5ec   :  { %2859 = vmatprep.mubr.msk.f32.mxu0 %vm404_vm0, %v3774_v12  ;;  %v3089_v42 = vpack.c.bf16 %v1607_v41, %v1599_v40  ;;  %v1710_v40 = vld [vmem:[#allocation8 + $0x380] sm:$0xff] }
 0x5ed   :  { %v1718_v41 = vld [vmem:[#allocation8 + $0x3c0] sm:$0xff] }
 0x5ee   :  { %v3119_v2 = vpack.c.bf16 %v1718_v41, %v1710_v40 }
 0x5f1   :  { %3042 = vmatpush3.bf16.xpose.msk.msra.mxu0 %vm3760_vm1, %v3788_v24 }
 0x5f2   :  { %3090 = vmatprep.subr.bf16.mxu0 %v3089_v42 }
 0x5f8   :  { %2860 = vmatmul.mubr.msk.f32.vlgmr.msra.gmra.mrb[14].mxu0 %vm404_vm0, %v3782_v20 }
 0x5f9   :  { %1831 = vmatprep.mubr.f32.mxu0 %v3583_v9  ;;  %3092 = vmatpush1.bf16.msra.mxu0 %v3091_v47 }
 0x5fa   :  { %3094 = vmatprep.subr.bf16.mxu0 %v3093_v48 }
 0x6be   :  { %v2854_v50 = vpop.f32.mrb[12].mxu0 }
 0x6bf   :  { %v967_v51 = vpop.f32.mrb[13].mxu0  ;;  %v3893_v19 = vadd.f32 %v2854_v50, %v3718_v1  ;;  %v1622_v50 = vld [vmem:[#allocation8 + $0xc0] sm:$0xff] }
 0x6c0   :  { %v3889_v6 = vadd.f32 %v967_v51, %v3715_v0  ;;  %v1631_v51 = vld [vmem:[#allocation8 + $0x108] sm:$0xff] }
 0x6cb   :  { %v2861_v52 = vpop.f32.mrb[14].mxu0 }
 0x6cc   :  { %v1054_v53 = vpop.f32.mrb[15].mxu0  ;;  %v1066_v33 = vsel %vm492_vm2, %v2861_v52, -inf }
 0x6cd   :  { %v1063_v54 = vsel %vm492_vm2, %v1054_v53, -inf }
 0x6ce   :  { %1064 = vmax.xlane.f32.xlu0 %v1063_v54 }
 0x6d2   :  { %1067 = vmax.xlane.f32.xlu0 %v1066_v33 }
 0x75b   :  { %v1065_v55 = vpop.xlane.xlu0 %1064 }
 0x75c   :  { %v1069_v56 = vsub.f32 %v1054_v53, %v1065_v55  ;;  %v3095_v53 = vpack.c.bf16 %v1622_v50, %v1614_v29 }
 0x75e   :  { %v1071_v57 = vmul.f32 1.442695, %v1069_v56  ;;  %3096 = vmatpush1.bf16.msra.mxu0 %v3095_v53 }
 0x75f   :  { %v1068_v58 = vpop.xlane.xlu0 %1067 }
 0x760   :  { %3342 = vpow2.f32 %v1071_v57  ;;  %v1070_v24 = vsub.f32 %v2861_v52, %v1068_v58  ;;  %v1639_v52 = vld [vmem:[#allocation8 + $0x148] sm:$0xff] }
 0x761   :  { %v3097_v54 = vpack.c.bf16 %v1639_v52, %v1631_v51  ;;  %v1647_v58 = vld [vmem:[#allocation8 + $0x188] sm:$0xff] }
 0x762   :  { %v1073_v59 = vmul.f32 1.442695, %v1070_v24  ;;  %v1655_v24 = vld [vmem:[#allocation8 + $0x1c8] sm:$0xff] }
 0x763   :  { %3098 = vmatprep.subr.bf16.mxu0 %v3097_v54 }
 0x764   :  { %3344 = vpow2.f32 %v1073_v59  ;;  %v3101_v59 = vpack.c.bf16 %v1655_v24, %v1647_v58  ;;  %v1608_v58 = vld [vmem:[#allocation8 + $0x50] sm:$0xff]  ;;  %v1617_v24 = vld [vmem:[#allocation8 + $0x98] sm:$0xff] }
 0x76a   :  { %v3343_v20 = vpop.eup %3342 }
 0x76b   :  { %v1075_v60 = vsel %vm492_vm2, %v3343_v20, 0.0 }
 0x76c   :  { %1076 = vadd.xlane.f32.xlu0 %v1075_v60  ;;  %v1654_v60 = vld [vmem:[#allocation8 + $0x1c0] sm:$0xff] }
 0x76e   :  { %v3345_v61 = vpop.eup %3344 }
 0x76f   :  { %v1078_v62 = vsel %vm492_vm2, %v3345_v61, 0.0 }
 0x770   :  { %1079 = vadd.xlane.f32.xlu0 %v1078_v62  ;;  %v1663_v62 = vld [vmem:[#allocation8 + $0x208] sm:$0xff] }
 0x786   :  { %1166 = vrot.lane.b32.xlu0 %v3774_v12, %s3577_s18  ;;  %v1169_v12 = vpop.permute.xlu1 %1168 }
 0x7f9   :  { %v1077_v63 = vpop.xlane.xlu0 %1076 }
 0x7fa   :  { %3346 = vrcp.f32 %v1077_v63  ;;  %v1671_v63 = vld [vmem:[#allocation8 + $0x248] sm:$0xff] }
 0x7fd   :  { %v1080_v3 = vpop.xlane.xlu0 %1079 }
 0x7fe   :  { %3348 = vrcp.f32 %v1080_v3  ;;  %v3105_v3 = vpack.c.bf16 %v1671_v63, %v1663_v62  ;;  %v1632_v63 = vld [vmem:[#allocation8 + $0x110] sm:$0xff] }
 0x801   :  { %v1167_v11 = vpop.permute.xlu0 %1166 }
 0x804   :  { %v3347_v4 = vpop.eup %3346 }
 0x805   :  { %v1083_v7 = vmul.f32 %v3347_v4, %v3343_v20  ;;  %v1646_v20 = vld [vmem:[#allocation8 + $0x180] sm:$0xff] }
 0x806   :  { %v1662_v4 = vld [vmem:[#allocation8 + $0x200] sm:$0xff] }
 0x807   :  { %2866 = vmatprep.mubr.msk.f32.mxu1 %vm492_vm2, %v1083_v7  ;;  %v1670_v7 = vld [vmem:[#allocation8 + $0x240] sm:$0xff] }
 0x808   :  { %v3349_v8 = vpop.eup %3348 }
 0x809   :  { %v1084_v10 = vmul.f32 %v3349_v8, %v3345_v61  ;;  %v3103_v61 = vpack.c.bf16 %v1654_v60, %v1646_v20  ;;  %v3107_v8 = vpack.c.bf16 %v1670_v7, %v1662_v4  ;;  %v1616_v20 = vld [vmem:[#allocation8 + $0x90] sm:$0xff]  ;;  %v1633_v60 = vld [vmem:[#allocation8 + $0x118] sm:$0xff] }
 0x80a   :  { %v1649_v4 = vld [vmem:[#allocation8 + $0x198] sm:$0xff] }
 0x80b   :  { %2867 = vmatmul.mubr.msk.f32.vlgmr.msra.gmra.mrb[8].mxu1 %vm492_vm2, %v1084_v10  ;;  %v1679_v10 = vld [vmem:[#allocation8 + $0x288] sm:$0xff] }
 0x80c   :  { %3052 = vmatpush3.bf16.xpose.msk.msra.mxu1 %vm3760_vm1, %v3816_v26  ;;  %2873 = vmatprep.mubr.msk.f32.mxu1 %vm404_vm0, %v1167_v11  ;;  %v1687_v11 = vld [vmem:[#allocation8 + $0x2c8] sm:$0xff] }
 0x813   :  { %2874 = vmatmul.mubr.msk.f32.vlgmr.msra.gmra.mrb[10].mxu1 %vm404_vm0, %v1169_v12  ;;  %v1678_v12 = vld [vmem:[#allocation8 + $0x280] sm:$0xff] }
 0x8de   :  { %v3882_v13 = vpop.f32.mrb[8].mxu1 }
 0x8df   :  { %v3884_v14 = vpop.f32.mrb[9].mxu1 }
 0x8e6   :  { %v2875_v15 = vpop.f32.mrb[10].mxu1 }
 0x8e7   :  { %v1248_v16 = vpop.f32.mrb[11].mxu1  ;;  %v1260_v17 = vsel %vm492_vm2, %v2875_v15, -inf }
 0x8e8   :  { %1261 = vmax.xlane.f32.xlu0 %v1260_v17  ;;  %v1257_v18 = vsel %vm492_vm2, %v1248_v16, -inf  ;;  %v1695_v17 = vld [vmem:[#allocation8 + $0x308] sm:$0xff] }
 0x8e9   :  { %1258 = vmax.xlane.f32.xlu1 %v1257_v18  ;;  %v1703_v18 = vld [vmem:[#allocation8 + $0x348] sm:$0xff] }
 0x8ec   :  { %1534 = vadd.xlane.f32.xlu0 %v3889_v6 }
 0x8f0   :  { %1536 = vadd.xlane.f32.xlu0 %v3893_v19 }
 0x975   :  { %v1262_v22 = vpop.xlane.xlu0 %1261 }
 0x976   :  { %v1264_v26 = vsub.f32 %v2875_v15, %v1262_v22  ;;  %v1259_v30 = vpop.xlane.xlu1 %1258  ;;  %v3109_v15 = vpack.c.bf16 %v1687_v11, %v1679_v10  ;;  %v1648_v10 = vld [vmem:[#allocation8 + $0x190] sm:$0xff] }
 0x977   :  { %v1263_v31 = vsub.f32 %v1248_v16, %v1259_v30  ;;  %v1686_v16 = vld [vmem:[#allocation8 + $0x2c0] sm:$0xff]  ;;  %v1656_v11 = vld [vmem:[#allocation8 + $0x1d0] sm:$0xff] }
 0x978   :  { %v1267_v34 = vmul.f32 1.442695, %v1264_v26  ;;  %v3111_v22 = vpack.c.bf16 %v1686_v16, %v1678_v12  ;;  %v3113_v26 = vpack.c.bf16 %v1703_v18, %v1695_v17  ;;  %v1694_v30 = vld [vmem:[#allocation8 + $0x300] sm:$0xff]  ;;  %v1665_v12 = vld [vmem:[#allocation8 + $0x218] sm:$0xff]  ;;  %v1664_v17 = vld [vmem:[#allocation8 + $0x210] sm:$0xff] }
 0x979   :  { %v1265_v36 = vmul.f32 1.442695, %v1263_v31  ;;  %v1535_v33 = vpop.xlane.xlu0 %1534  ;;  %v1702_v31 = vld [vmem:[#allocation8 + $0x340] sm:$0xff]  ;;  %v1672_v18 = vld [vmem:[#allocation8 + $0x250] sm:$0xff] }
 0x97a   :  { %3350 = vpow2.f32 %v1267_v34  ;;  %v1542_v55 = vmul.f32 0.0078125, %v1535_v33  ;;  %v1711_v34 = vld [vmem:[#allocation8 + $0x388] sm:$0xff]  ;;  %v1601_v33 = vld [vmem:[#allocation8 + $0x18] sm:$0xff] }
 0x97b   :  { %3352 = vpow2.f32 %v1265_v36  ;;  %v1719_v36 = vld [vmem:[#allocation8 + $0x3c8] sm:$0xff] }
 0x97c   :  { %v3909_v56 = vsub.f32 %v3889_v6, %v1542_v55  ;;  %v1609_v55 = vld [vmem:[#allocation8 + $0x58] sm:$0xff] }
 0x97e   :  { %v1550_v57 = vmul.f32 %v3909_v56, %v3909_v56 }
 0x984   :  { %v3896_v37 = vpop.eup %3350 }
 0x985   :  { %v1272_v0 = vsel %vm492_vm2, %v3896_v37, 0.0  ;;  %v3900_v38 = vpop.eup %3352 }
 0x986   :  { %1273 = vadd.xlane.f32.xlu1 %v1272_v0  ;;  %v1269_v1 = vsel %vm492_vm2, %v3900_v38, 0.0  ;;  %v3115_v0 = vpack.c.bf16 %v1702_v31, %v1694_v30  ;;  %v3139_v30 = vpack.c.bf16 %v1672_v18, %v1664_v17  ;;  %v1619_v17 = vld [vmem:[#allocation8 + $0xa8] sm:$0xff] }
 0x987   :  { %v1627_v18 = vld [vmem:[#allocation8 + $0xe8] sm:$0xff] }
 0x98a   :  { %1270 = vadd.xlane.f32.xlu1 %v1269_v1  ;;  %v3117_v1 = vpack.c.bf16 %v1719_v36, %v1711_v34  ;;  %v1680_v34 = vld [vmem:[#allocation8 + $0x290] sm:$0xff] }
 0x98b   :  { %v1688_v36 = vld [vmem:[#allocation8 + $0x2d0] sm:$0xff] }
 0x98c   :  { %v3143_v40 = vpack.c.bf16 %v1688_v36, %v1680_v34  ;;  %v1626_v34 = vld [vmem:[#allocation8 + $0xe0] sm:$0xff] }
 0x99b   :  { %3314 = vrot.lane.b32.xlu1 %v3313_v27, %s3577_s18  ;;  %v3099_v27 = vpack.c.bf16 %v1638_v23, %v1630_v21 }
 0x99d   :  { %3100 = vmatpush1.bf16.msra.mxu0 %v3099_v27 }
 0x99e   :  { %3102 = vmatprep.subr.bf16.mxu0 %v3101_v59 }
 0x9a1   :  { %3104 = vmatpush1.bf16.msra.mxu0 %v3103_v61  ;;  %v1641_v61 = vld [vmem:[#allocation8 + $0x158] sm:$0xff] }
 0x9a2   :  { %3106 = vmatprep.subr.bf16.mxu0 %v3105_v3  ;;  %v3129_v62 = vpack.c.bf16 %v1641_v61, %v1633_v60  ;;  %v1640_v3 = vld [vmem:[#allocation8 + $0x150] sm:$0xff] }
 0x9a3   :  { %v3131_v7 = vpack.c.bf16 %v1640_v3, %v1632_v63 }
 0x9a5   :  { %3108 = vmatpush1.bf16.msra.mxu0 %v3107_v8 }
 0x9a6   :  { %3110 = vmatprep.subr.bf16.mxu0 %v3109_v15  ;;  %v1673_v15 = vld [vmem:[#allocation8 + $0x258] sm:$0xff] }
 0x9a7   :  { %v3137_v16 = vpack.c.bf16 %v1673_v15, %v1665_v12 }
 0x9a9   :  { %3112 = vmatpush1.bf16.msra.mxu0 %v3111_v22  ;;  %v1681_v22 = vld [vmem:[#allocation8 + $0x298] sm:$0xff] }
 0x9aa   :  { %3114 = vmatprep.subr.bf16.mxu0 %v3113_v26  ;;  %v1689_v26 = vld [vmem:[#allocation8 + $0x2d8] sm:$0xff] }
 0x9ab   :  { %v3141_v31 = vpack.c.bf16 %v1689_v26, %v1681_v22  ;;  %v1621_v22 = vld [vmem:[#allocation8 + $0xb8] sm:$0xff]  ;;  %v3157_v26 = vpack.c.bf16 %v1627_v18, %v1619_v17  ;;  %v1676_v17 = vld [vmem:[#allocation8 + $0x270] sm:$0xff]  ;;  %v1683_v18 = vld [vmem:[#allocation8 + $0x2a8] sm:$0xff] }
 0x9ad   :  { %3116 = vmatpush1.bf16.msra.mxu0 %v3115_v0  ;;  %v1697_v0 = vld [vmem:[#allocation8 + $0x318] sm:$0xff] }
 0x9ae   :  { %3118 = vmatprep.subr.bf16.mxu0 %v3117_v1  ;;  %v1705_v1 = vld [vmem:[#allocation8 + $0x358] sm:$0xff] }
 0x9af   :  { %v3145_v41 = vpack.c.bf16 %v1705_v1, %v1697_v0  ;;  %v1620_v1 = vld [vmem:[#allocation8 + $0xb0] sm:$0xff] }
 0x9b1   :  { %3120 = vmatpush1.bf16.msra.mxu0 %v3119_v2  ;;  %v1696_v2 = vld [vmem:[#allocation8 + $0x310] sm:$0xff] }
 0x9bf   :  { %1554 = vadd.xlane.f32.xlu1 %v1550_v57  ;;  %v1600_v57 = vld [vmem:[#allocation8 + $0x10] sm:$0xff] }
 0xa13   :  { %v1274_v42 = vpop.xlane.xlu1 %1273 }
 0xa14   :  { %3354 = vrcp.f32 %v1274_v42  ;;  %v1704_v42 = vld [vmem:[#allocation8 + $0x350] sm:$0xff] }
 0xa17   :  { %v1271_v43 = vpop.xlane.xlu1 %1270 }
 0xa18   :  { %3356 = vrcp.f32 %v1271_v43  ;;  %v1713_v43 = vld [vmem:[#allocation8 + $0x398] sm:$0xff] }
 0xa1b   :  { %v3315_v44 = vpop.permute.xlu1 %3314 }
 0xa1c   :  { %v3317_v46 = vunpack.i.h.bf16 %v3315_v44  ;;  %v3316_v47 = vunpack.i.l.bf16 %v3315_v44  ;;  %v1721_v44 = vld [vmem:[#allocation8 + $0x3d8] sm:$0xff] }
 0xa1e   :  { %v3053_v48 = vpack.c.bf16 %v3317_v46, %v3316_v47  ;;  %v3355_v29 = vpop.eup %3354  ;;  %v3147_v46 = vpack.c.bf16 %v1704_v42, %v1696_v2  ;;  %v3149_v47 = vpack.c.bf16 %v1721_v44, %v1713_v43  ;;  %v1635_v42 = vld [vmem:[#allocation8 + $0x128] sm:$0xff]  ;;  %v1637_v44 = vld [vmem:[#allocation8 + $0x138] sm:$0xff] }
 0xa1f   :  { %v1278_v52 = vmul.f32 %v3355_v29, %v3896_v37  ;;  %v1720_v29 = vld [vmem:[#allocation8 + $0x3d0] sm:$0xff]  ;;  %v1643_v43 = vld [vmem:[#allocation8 + $0x168] sm:$0xff] }
 0xa20   :  { %3054 = vmatprep.subr.bf16.mxu1 %v3053_v48 }
 0xa21   :  { %3056 = vmatpush3.bf16.msra.mxu1 %v3053_v48  ;;  %v1712_v48 = vld [vmem:[#allocation8 + $0x390] sm:$0xff] }
 0xa22   :  { %v3357_v50 = vpop.eup %3356  ;;  %3058 = vmatprep.subr.bf16.mxu1 %v3812_v5 }
 0xa23   :  { %v1277_v51 = vmul.f32 %v3357_v50, %v3900_v38  ;;  %v3151_v50 = vpack.c.bf16 %v1720_v29, %v1712_v48  ;;  %v1645_v48 = vld [vmem:[#allocation8 + $0x178] sm:$0xff]  ;;  %v1634_v29 = vld [vmem:[#allocation8 + $0x120] sm:$0xff] }
 0xa25   :  { %2880 = vmatprep.mubr.msk.f32.mxu1 %vm492_vm2, %v1277_v51 }
 0xa26   :  { %2881 = vmatmul.mubr.msk.f32.vlgmr.msra.gmra.mrb[12].mxu1 %vm492_vm2, %v1278_v52 }
 0xa27   :  { %3060 = vmatpush3.bf16.msra.mxu1 %v3812_v5  ;;  %v3929_v5 = vld [vmem:[%s4208_s5] ss:$0 sm:$0xff] }
 0xa28   :  { %3062 = vmatprep.subr.bf16.mxu1 %v3819_v28 }
 0xa2b   :  { %3064 = vmatpush3.bf16.msra.mxu1 %v3819_v28 }
 0xa2c   :  { %3066 = vmatprep.subr.bf16.mxu1 %v3829_v32 }
 0xa2f   :  { %3068 = vmatpush3.bf16.msra.mxu1 %v3829_v32  ;;  %v3935_v32 = vld [vmem:[%s4209_s6] ss:$0 sm:$0xff] }
 0xa30   :  { %3070 = vmatprep.subr.bf16.mxu1 %v3833_v25 }
 0xa33   :  { %3072 = vmatpush3.bf16.msra.mxu1 %v3833_v25 }
 0xa34   :  { %3074 = vmatprep.subr.bf16.mxu1 %v3838_v39 }
 0xa4c   :  { %v1555_v37 = vpop.xlane.xlu1 %1554 }
 0xa4d   :  { %v1562_v38 = vmul.f32 0.0078125, %v1555_v37  ;;  %v1537_v37 = vpop.xlane.xlu0 %1536 }
 0xa4f   :  { %v1566_v53 = vadd.f32 1e-05, %v1562_v38 }
 0xa51   :  { %3358 = vrsqrt.f32 %v1566_v53 }
 0xa5b   :  { %v3359_v54 = vpop.eup %3358 }
 0xa5c   :  { %v1574_v28 = vmul.f32 %v3359_v54, %v3909_v56  ;;  %v3121_v56 = vpack.c.bf16 %v1609_v55, %v1601_v33  ;;  %v1543_v54 = vmul.f32 0.0078125, %v1537_v37  ;;  %v3193_v37 = vpack.c.bf16 %v1645_v48, %v1637_v44  ;;  %v1707_v44 = vld [vmem:[#allocation8 + $0x368] sm:$0xff]  ;;  %v1709_v48 = vld [vmem:[#allocation8 + $0x378] sm:$0xff] }
 0xa5e   :  { %v1584_v25 = vmul.f32 %v3929_v5, %v1574_v28  ;;  %v3430_v28 = vld [vmem:[#allocation2 + $0x10] sm:$0xff] }
 0xa60   :  { %v3939_v21 = vadd.f32 %v3935_v32, %v1584_v25 }
 0xa62   :  { %1832 = vmatmul.mubr.f32.vlgmr.msra.gmra.mrb[16].mxu0 %v3939_v21 }
 0xa63   :  { %1837 = vmatprep.mubr.f32.mxu0 %v3583_v9 }
 0xaf9   :  { %v2882_v23 = vpop.f32.mrb[12].mxu1 }
 0xafa   :  { %v1359_v27 = vpop.f32.mrb[13].mxu1 }
 0xafb   :  { %2899 = vmatprep.mubr.msk.f32.mxu1 %vm404_vm0, %v1359_v27  ;;  %v3431_v27 = vld [vmem:[#allocation2 + $0x18] sm:$0xff] }
 0xafc   :  { %2900 = vmatmul.mubr.msk.f32.vlgmr.msra.gmra.mrb[14].mxu1 %vm404_vm0, %v2882_v23  ;;  %v1547_v23 = vsub.f32 %v3893_v19, %v1543_v54  ;;  %v1644_v54 = vld [vmem:[#allocation8 + $0x170] sm:$0xff] }
 0xafd   :  { %3076 = vmatpush3.bf16.msra.mxu1 %v3838_v39  ;;  %2918 = vmatprep.mubr.msk.f32.mxu1 %vm404_vm0, %v3884_v14  ;;  %v1625_v39 = vld [vmem:[#allocation8 + $0xd8] sm:$0xff]  ;;  %v3123_v14 = vpack.c.bf16 %v1608_v58, %v1600_v57  ;;  %v1603_v58 = vld [vmem:[#allocation8 + $0x28] sm:$0xff] }
 0xafe   :  { %3078 = vmatprep.subr.bf16.mxu1 %v3841_v45  ;;  %v3125_v59 = vpack.c.bf16 %v1625_v39, %v1617_v24  ;;  %v1551_v55 = vmul.f32 %v1547_v23, %v1547_v23  ;;  %v1611_v24 = vld [vmem:[#allocation8 + $0x68] sm:$0xff]  ;;  %v1605_v39 = vld [vmem:[#allocation8 + $0x38] sm:$0xff] }
 0xb01   :  { %3080 = vmatpush3.bf16.msra.mxu1 %v3841_v45  ;;  %v1624_v45 = vld [vmem:[#allocation8 + $0xd0] sm:$0xff] }
 0xb02   :  { %3082 = vmatprep.subr.bf16.mxu1 %v3848_v35 }
 0xb05   :  { %3084 = vmatpush3.bf16.msra.mxu1 %v3848_v35  ;;  %v3127_v35 = vpack.c.bf16 %v1624_v45, %v1616_v20  ;;  %v1602_v20 = vld [vmem:[#allocation8 + $0x20] sm:$0xff] }
 0xb06   :  { %3086 = vmatprep.subr.bf16.mxu1 %v3852_v49  ;;  %v1610_v45 = vld [vmem:[#allocation8 + $0x60] sm:$0xff] }
 0xb07   :  { %v3155_v61 = vpack.c.bf16 %v1610_v45, %v1602_v20  ;;  %v1658_v20 = vld [vmem:[#allocation8 + $0x1e0] sm:$0xff] }
 0xb09   :  { %3088 = vmatpush3.bf16.msra.mxu1 %v3852_v49  ;;  %v1657_v49 = vld [vmem:[#allocation8 + $0x1d8] sm:$0xff] }
 0xb0a   :  { %3122 = vmatprep.subr.bf16.mxu1 %v3121_v56  ;;  %v3133_v8 = vpack.c.bf16 %v1657_v49, %v1649_v4 }
 0xb0c   :  { %2919 = vmatmul.mubr.msk.f32.vlgmr.msra.gmra.mrb[14].mxu1 %vm404_vm0, %v3882_v13  ;;  %v3135_v13 = vpack.c.bf16 %v1656_v11, %v1648_v10 }
 0xb0d   :  { %3124 = vmatpush1.bf16.msra.mxu1 %v3123_v14  ;;  %1920 = vmatprep.mubr.f32.mxu1 %v3583_v9  ;;  %v3153_v14 = vpack.c.bf16 %v1611_v24, %v1603_v58  ;;  %v1659_v58 = vld [vmem:[#allocation8 + $0x1e8] sm:$0xff]  ;;  %v1653_v24 = vld [vmem:[#allocation8 + $0x1b8] sm:$0xff] }
 0xb0e   :  { %3126 = vmatprep.subr.bf16.mxu1 %v3125_v59  ;;  %v1613_v59 = vld [vmem:[#allocation8 + $0x78] sm:$0xff] }
 0xb0f   :  { %v3185_v60 = vpack.c.bf16 %v1613_v59, %v1605_v39  ;;  %3154 = vmatprep.subr.bf16.mxu0 %v3153_v14  ;;  %v1661_v14 = vld [vmem:[#allocation8 + $0x1f8] sm:$0xff]  ;;  %v1650_v59 = vld [vmem:[#allocation8 + $0x1a0] sm:$0xff] }
 0xb10   :  { %3156 = vmatpush1.bf16.msra.mxu0 %v3155_v61  ;;  %v3197_v45 = vpack.c.bf16 %v1661_v14, %v1653_v24  ;;  %v1652_v61 = vld [vmem:[#allocation8 + $0x1b0] sm:$0xff]  ;;  %v1714_v14 = vld [vmem:[#allocation8 + $0x3a0] sm:$0xff] }
 0xb11   :  { %3128 = vmatpush1.bf16.msra.mxu1 %v3127_v35  ;;  %v1604_v35 = vld [vmem:[#allocation8 + $0x30] sm:$0xff]  ;;  %3158 = vmatprep.subr.bf16.mxu0 %v3157_v26 }
 0xb12   :  { %3130 = vmatprep.subr.bf16.mxu1 %v3129_v62  ;;  %v1612_v62 = vld [vmem:[#allocation8 + $0x70] sm:$0xff] }
 0xb13   :  { %v3187_v63 = vpack.c.bf16 %v1612_v62, %v1604_v35  ;;  %v1660_v35 = vld [vmem:[#allocation8 + $0x1f0] sm:$0xff]  ;;  %v1667_v62 = vld [vmem:[#allocation8 + $0x228] sm:$0xff] }
 0xb15   :  { %3132 = vmatpush1.bf16.msra.mxu1 %v3131_v7 }
 0xb16   :  { %3134 = vmatprep.subr.bf16.mxu1 %v3133_v8 }
 0xb19   :  { %3136 = vmatpush1.bf16.msra.mxu1 %v3135_v13 }
 0xb1a   :  { %3138 = vmatprep.subr.bf16.mxu1 %v3137_v16 }
 0xb1d   :  { %3140 = vmatpush1.bf16.msra.mxu1 %v3139_v30  ;;  %v1629_v30 = vld [vmem:[#allocation8 + $0xf8] sm:$0xff] }
 0xb1e   :  { %3142 = vmatprep.subr.bf16.mxu1 %v3141_v31  ;;  %v1618_v31 = vld [vmem:[#allocation8 + $0xa0] sm:$0xff]  ;;  %v3189_v36 = vpack.c.bf16 %v1629_v30, %v1621_v22  ;;  %v1691_v22 = vld [vmem:[#allocation8 + $0x2e8] sm:$0xff] }
 0xb1f   :  { %v3159_v0 = vpack.c.bf16 %v1626_v34, %v1618_v31  ;;  %v3173_v30 = vpack.c.bf16 %v1691_v22, %v1683_v18  ;;  %v1685_v31 = vld [vmem:[#allocation8 + $0x2b8] sm:$0xff] }
 0xb20   :  { %v1693_v34 = vld [vmem:[#allocation8 + $0x2f8] sm:$0xff] }
 0xb21   :  { %3144 = vmatpush1.bf16.msra.mxu1 %v3143_v40  ;;  %v1628_v40 = vld [vmem:[#allocation8 + $0xf0] sm:$0xff]  ;;  %3160 = vmatpush1.bf16.msra.mxu0 %v3159_v0  ;;  %v3205_v0 = vpack.c.bf16 %v1693_v34, %v1685_v31  ;;  %v2300_v31 = vld [vmem:[#allocation10 + $0x188] sm:$0xff]  ;;  %v2251_v34 = vld [vmem:[#allocation10] sm:$0xff] }
 0xb22   :  { %3146 = vmatprep.subr.bf16.mxu1 %v3145_v41  ;;  %v3191_v41 = vpack.c.bf16 %v1628_v40, %v1620_v1  ;;  %v1690_v1 = vld [vmem:[#allocation8 + $0x2e0] sm:$0xff]  ;;  %v1684_v40 = vld [vmem:[#allocation8 + $0x2b0] sm:$0xff] }
 0xb25   :  { %3148 = vmatpush1.bf16.msra.mxu1 %v3147_v46 }
 0xb26   :  { %3150 = vmatprep.subr.bf16.mxu1 %v3149_v47  ;;  %v3161_v47 = vpack.c.bf16 %v1643_v43, %v1635_v42  ;;  %v1699_v43 = vld [vmem:[#allocation8 + $0x328] sm:$0xff] }
 0xb28   :  { %3162 = vmatprep.subr.bf16.mxu0 %v3161_v47  ;;  %v3177_v47 = vpack.c.bf16 %v1707_v44, %v1699_v43  ;;  %v2301_v43 = vld [vmem:[#allocation10 + $0x190] sm:$0xff] }
 0xb29   :  { %3152 = vmatpush1.bf16.msra.mxu1 %v3151_v50  ;;  %v1642_v50 = vld [vmem:[#allocation8 + $0x160] sm:$0xff] }
 0xb2a   :  { %3186 = vmatprep.subr.bf16.mxu1 %v3185_v60  ;;  %v3167_v60 = vpack.c.bf16 %v1658_v20, %v1650_v59  ;;  %v1722_v59 = vld [vmem:[#allocation8 + $0x3e0] sm:$0xff] }
 0xb2c   :  { %1921 = vmatmul.mubr.f32.vlgmr.msra.gmra.mrb[16].mxu1 %v3939_v21 }
 0xb2d   :  { %1926 = vmatprep.mubr.f32.mxu1 %v3583_v9  ;;  %3188 = vmatpush1.bf16.msra.mxu1 %v3187_v63  ;;  %v3199_v63 = vpack.c.bf16 %v1660_v35, %v1652_v61  ;;  %v1724_v61 = vld [vmem:[#allocation8 + $0x3f0] sm:$0xff] }
 0xb2e   :  { %3190 = vmatprep.subr.bf16.mxu1 %v3189_v36  ;;  %v1682_v36 = vld [vmem:[#allocation8 + $0x2a0] sm:$0xff] }
 0xb31   :  { %3192 = vmatpush1.bf16.msra.mxu1 %v3191_v41  ;;  %v1692_v41 = vld [vmem:[#allocation8 + $0x2f0] sm:$0xff] }
 0xb32   :  { %3194 = vmatprep.subr.bf16.mxu1 %v3193_v37  ;;  %v3207_v42 = vpack.c.bf16 %v1692_v41, %v1684_v40  ;;  %v2284_v40 = vld [vmem:[#allocation10 + $0x108] sm:$0xff] }
 0xb35   :  { %v3959_v51 = vpop.f32.mrb[16].mxu0 }
 0xb36   :  { %v3961_v52 = vpop.f32.mrb[17].mxu0 }
 0xbdf   :  { %v2920_v38 = vpop.f32.mrb[14].mxu1 }
 0xbe0   :  { %v1521_v53 = vpop.f32.mrb[15].mxu1  ;;  %v3967_v33 = vadd.f32 %v3431_v27, %v2920_v38  ;;  %v3163_v38 = vpack.c.bf16 %v1642_v50, %v1634_v29  ;;  %v1698_v29 = vld [vmem:[#allocation8 + $0x320] sm:$0xff] }
 0xbe1   :  { %v3963_v25 = vadd.f32 %v3430_v28, %v1521_v53  ;;  %v1636_v53 = vld [vmem:[#allocation8 + $0x130] sm:$0xff]  ;;  %v1706_v50 = vld [vmem:[#allocation8 + $0x360] sm:$0xff] }
 0xbe2   :  { %v3195_v27 = vpack.c.bf16 %v1644_v54, %v1636_v53  ;;  %3164 = vmatpush1.bf16.msra.mxu0 %v3163_v38  ;;  %v3179_v38 = vpack.c.bf16 %v1706_v50, %v1698_v29  ;;  %v1700_v53 = vld [vmem:[#allocation8 + $0x330] sm:$0xff] }
 0xbe3   :  { %1538 = vadd.xlane.f32.xlu0 %v3963_v25  ;;  %v1708_v54 = vld [vmem:[#allocation8 + $0x370] sm:$0xff] }
 0xbe4   :  { %3196 = vmatpush1.bf16.msra.mxu1 %v3195_v27  ;;  %v1715_v27 = vld [vmem:[#allocation8 + $0x3a8] sm:$0xff] }
 0xbe5   :  { %3198 = vmatprep.subr.bf16.mxu1 %v3197_v45  ;;  %v3183_v45 = vpack.c.bf16 %v1722_v59, %v1714_v14  ;;  %v2256_v14 = vld [vmem:[#allocation10 + $0x28] sm:$0xff]  ;;  %v2287_v59 = vld [vmem:[#allocation10 + $0x120] sm:$0xff] }
 0xbe7   :  { %1540 = vadd.xlane.f32.xlu0 %v3967_v33 }
 0xbe8   :  { %3200 = vmatpush1.bf16.msra.mxu1 %v3199_v63 }
 0xbeb   :  { %1556 = vadd.xlane.f32.xlu0 %v1551_v55  ;;  %v1651_v55 = vld [vmem:[#allocation8 + $0x1a8] sm:$0xff] }
 0xbec   :  { %v3165_v39 = vpack.c.bf16 %v1659_v58, %v1651_v55  ;;  %v1723_v55 = vld [vmem:[#allocation8 + $0x3e8] sm:$0xff]  ;;  %v1717_v58 = vld [vmem:[#allocation8 + $0x3b8] sm:$0xff] }
 0xbed   :  { %v3181_v24 = vpack.c.bf16 %v1723_v55, %v1715_v27  ;;  %v2303_v27 = vld [vmem:[#allocation10 + $0x1a0] sm:$0xff] }
 0xbee   :  { %3166 = vmatprep.subr.bf16.mxu0 %v3165_v39  ;;  %v1725_v39 = vld [vmem:[#allocation8 + $0x3f8] sm:$0xff] }
 0xbef   :  { %3168 = vmatpush1.bf16.msra.mxu0 %v3167_v60  ;;  %v3213_v20 = vpack.c.bf16 %v1725_v39, %v1717_v58  ;;  %v1716_v60 = vld [vmem:[#allocation8 + $0x3b0] sm:$0xff]  ;;  %v2304_v58 = vld [vmem:[#allocation10 + $0x1a8] sm:$0xff]  ;;  %v2255_v39 = vld [vmem:[#allocation10 + $0x20] sm:$0xff] }
 0xbf0   :  { %v3215_v35 = vpack.c.bf16 %v1724_v61, %v1716_v60  ;;  %v2273_v61 = vld [vmem:[#allocation10 + $0xb0] sm:$0xff] }
 0xbff   :  { %v3970_v56 = vpop.f32.mrb[16].mxu1 }
 0xc00   :  { %v3972_v57 = vpop.f32.mrb[17].mxu1 }
 0xc70   :  { %v1539_v3 = vpop.xlane.xlu0 %1538 }
 0xc71   :  { %v1544_v4 = vmul.f32 0.0078125, %v1539_v3  ;;  %v1675_v3 = vld [vmem:[#allocation8 + $0x268] sm:$0xff] }
 0xc73   :  { %v3975_v49 = vsub.f32 %v3963_v25, %v1544_v4  ;;  %v1669_v4 = vld [vmem:[#allocation8 + $0x238] sm:$0xff] }
 0xc74   :  { %v1541_v7 = vpop.xlane.xlu0 %1540 }
 0xc75   :  { %v1545_v8 = vmul.f32 0.0078125, %v1541_v7  ;;  %v1552_v10 = vmul.f32 %v3975_v49, %v3975_v49  ;;  %v1677_v7 = vld [vmem:[#allocation8 + $0x278] sm:$0xff] }
 0xc77   :  { %v3980_v11 = vsub.f32 %v3967_v33, %v1545_v8  ;;  %1558 = vadd.xlane.f32.xlu0 %v1552_v10  ;;  %v3169_v8 = vpack.c.bf16 %v1675_v3, %v1667_v62  ;;  %v3201_v10 = vpack.c.bf16 %v1677_v7, %v1669_v4 }
 0xc78   :  { %v1557_v12 = vpop.xlane.xlu0 %1556 }
 0xc79   :  { %v1563_v15 = vmul.f32 0.0078125, %v1557_v12  ;;  %v1553_v13 = vmul.f32 %v3980_v11, %v3980_v11  ;;  %v1666_v12 = vld [vmem:[#allocation8 + $0x220] sm:$0xff]  ;;  %3170 = vmatprep.subr.bf16.mxu0 %v3169_v8  ;;  %3202 = vmatprep.subr.bf16.mxu1 %v3201_v10 }
 0xc7b   :  { %v1567_v16 = vadd.f32 1e-05, %v1563_v15  ;;  %1560 = vadd.xlane.f32.xlu0 %v1553_v13  ;;  %v1674_v15 = vld [vmem:[#allocation8 + $0x260] sm:$0xff]  ;;  %v1668_v13 = vld [vmem:[#allocation8 + $0x230] sm:$0xff] }
 0xc7c   :  { %v3203_v26 = vpack.c.bf16 %v1676_v17, %v1668_v13 }
 0xc7d   :  { %3360 = vrsqrt.f32 %v1567_v16  ;;  %v3171_v16 = vpack.c.bf16 %v1674_v15, %v1666_v12 }
 0xc7e   :  { %3204 = vmatpush1.bf16.msra.mxu1 %v3203_v26  ;;  %v2299_v26 = vld [vmem:[#allocation10 + $0x180] sm:$0xff] }
 0xc7f   :  { %3172 = vmatpush1.bf16.msra.mxu0 %v3171_v16  ;;  %3206 = vmatprep.subr.bf16.mxu1 %v3205_v0  ;;  %v3249_v0 = vpack.c.bf16 %v2300_v31, %v2299_v26  ;;  %v2260_v26 = vld [vmem:[#allocation10 + $0x48] sm:$0xff] }
 0xc80   :  { %3174 = vmatprep.subr.bf16.mxu0 %v3173_v30 }
 0xc82   :  { %3208 = vmatpush1.bf16.msra.mxu1 %v3207_v42  ;;  %v2270_v42 = vld [vmem:[#allocation10 + $0x98] sm:$0xff] }
 0xc87   :  { %v3361_v2 = vpop.eup %3360 }
 0xc88   :  { %v1575_v46 = vmul.f32 %v3361_v2, %v1547_v23  ;;  %v3175_v2 = vpack.c.bf16 %v1690_v1, %v1682_v36  ;;  %v2252_v36 = vld [vmem:[#allocation10 + $0x8] sm:$0xff] }
 0xc89   :  { %v3219_v1 = vpack.c.bf16 %v2252_v36, %v2251_v34  ;;  %v2291_v34 = vld [vmem:[#allocation10 + $0x140] sm:$0xff]  ;;  %v2292_v36 = vld [vmem:[#allocation10 + $0x148] sm:$0xff] }
 0xc8a   :  { %v1585_v28 = vmul.f32 %v3929_v5, %v1575_v46  ;;  %v1701_v46 = vld [vmem:[#allocation8 + $0x338] sm:$0xff]  ;;  %3176 = vmatpush1.bf16.msra.mxu0 %v3175_v2  ;;  %v2269_v2 = vld [vmem:[#allocation10 + $0x90] sm:$0xff] }
 0xc8b   :  { %v3209_v37 = vpack.c.bf16 %v1709_v48, %v1701_v46  ;;  %3178 = vmatprep.subr.bf16.mxu0 %v3177_v47  ;;  %v3221_v44 = vpack.c.bf16 %v2270_v42, %v2269_v2  ;;  %v2302_v46 = vld [vmem:[#allocation10 + $0x198] sm:$0xff]  ;;  %v2253_v47 = vld [vmem:[#allocation10 + $0x10] sm:$0xff] }
 0xc8c   :  { %v3986_v23 = vadd.f32 %v3935_v32, %v1585_v28  ;;  %v3211_v28 = vpack.c.bf16 %v1708_v54, %v1700_v53  ;;  %v2254_v48 = vld [vmem:[#allocation10 + $0x18] sm:$0xff]  ;;  %v3253_v29 = vpack.c.bf16 %v2302_v46, %v2301_v43  ;;  %v2271_v54 = vld [vmem:[#allocation10 + $0xa0] sm:$0xff]  ;;  %v2261_v42 = vld [vmem:[#allocation10 + $0x50] sm:$0xff] }
 0xc8d   :  { %3210 = vmatprep.subr.bf16.mxu1 %v3209_v37  ;;  %v3223_v50 = vpack.c.bf16 %v2254_v48, %v2253_v47  ;;  %v2285_v37 = vld [vmem:[#allocation10 + $0x110] sm:$0xff]  ;;  %v2310_v2 = vld [vmem:[#allocation10 + $0x1d8] sm:$0xff] }
 0xc8e   :  { %1838 = vmatmul.mubr.f32.gmra.mrb[18].mxu0 %v3986_v23  ;;  %1927 = vmatmul.mubr.f32.gmra.mrb[18].mxu1 %v3986_v23  ;;  %v2262_v43 = vld [vmem:[#allocation10 + $0x58] sm:$0xff]  ;;  %v2293_v47 = vld [vmem:[#allocation10 + $0x150] sm:$0xff] }
 0xc8f   :  { %1843 = vmatprep.mubr.f32.mxu0 %v3583_v9  ;;  %1932 = vmatprep.mubr.f32.mxu1 %v3583_v9  ;;  %v3239_v46 = vpack.c.bf16 %v2262_v43, %v2261_v42  ;;  %v2294_v48 = vld [vmem:[#allocation10 + $0x158] sm:$0xff] }
 0xc90   :  { %3180 = vmatpush1.bf16.msra.mxu0 %v3179_v38  ;;  %3212 = vmatpush1.bf16.msra.mxu1 %v3211_v28  ;;  %v2286_v38 = vld [vmem:[#allocation10 + $0x118] sm:$0xff]  ;;  %v2272_v28 = vld [vmem:[#allocation10 + $0xa8] sm:$0xff] }
 0xc91   :  { %3182 = vmatprep.subr.bf16.mxu0 %v3181_v24  ;;  %3214 = vmatprep.subr.bf16.mxu1 %v3213_v20  ;;  %v3255_v53 = vpack.c.bf16 %v2286_v38, %v2285_v37  ;;  %v3225_v55 = vpack.c.bf16 %v2272_v28, %v2271_v54  ;;  %v3257_v24 = vpack.c.bf16 %v2304_v58, %v2303_v27  ;;  %v2280_v37 = vld [vmem:[#allocation10 + $0xe8] sm:$0xff]  ;;  %v2311_v38 = vld [vmem:[#allocation10 + $0x1e0] sm:$0xff] }
 0xc92   :  { %v3227_v20 = vpack.c.bf16 %v2256_v14, %v2255_v39  ;;  %v2312_v54 = vld [vmem:[#allocation10 + $0x1e8] sm:$0xff]  ;;  %v2263_v28 = vld [vmem:[#allocation10 + $0x60] sm:$0xff] }
 0xc93   :  { %v2264_v27 = vld [vmem:[#allocation10 + $0x68] sm:$0xff] }
 0xc94   :  { %3184 = vmatpush1.bf16.msra.mxu0 %v3183_v45  ;;  %3216 = vmatpush1.bf16.msra.mxu1 %v3215_v35  ;;  %v2288_v45 = vld [vmem:[#allocation10 + $0x128] sm:$0xff]  ;;  %v2274_v35 = vld [vmem:[#allocation10 + $0xb8] sm:$0xff]  ;;  %v3243_v58 = vpack.c.bf16 %v2264_v27, %v2263_v28 }
 0xc95   :  { %3250 = vmatprep.subr.bf16.mxu1 %v3249_v0  ;;  %v3259_v60 = vpack.c.bf16 %v2288_v45, %v2287_v59  ;;  %v3267_v0 = vpack.c.bf16 %v2292_v36, %v2291_v34  ;;  %v2296_v39 = vld [vmem:[#allocation10 + $0x168] sm:$0xff]  ;;  %v2281_v59 = vld [vmem:[#allocation10 + $0xf0] sm:$0xff] }
 0xc96   :  { %v2313_v45 = vld [vmem:[#allocation10 + $0x1f0] sm:$0xff] }
 0xd04   :  { %v1559_v62 = vpop.xlane.xlu0 %1558 }
 0xd05   :  { %v1564_v63 = vmul.f32 0.0078125, %v1559_v62  ;;  %v2305_v62 = vld [vmem:[#allocation10 + $0x1b0] sm:$0xff] }
 0xd07   :  { %v1568_v3 = vadd.f32 1e-05, %v1564_v63  ;;  %v3229_v63 = vpack.c.bf16 %v2274_v35, %v2273_v61  ;;  %v2314_v61 = vld [vmem:[#allocation10 + $0x1f8] sm:$0xff]  ;;  %v2265_v35 = vld [vmem:[#allocation10 + $0x70] sm:$0xff] }
 0xd08   :  { %v1561_v4 = vpop.xlane.xlu0 %1560 }
 0xd09   :  { %3362 = vrsqrt.f32 %v1568_v3  ;;  %v1565_v7 = vmul.f32 0.0078125, %v1561_v4  ;;  %v2306_v3 = vld [vmem:[#allocation10 + $0x1b8] sm:$0xff]  ;;  %v2257_v4 = vld [vmem:[#allocation10 + $0x30] sm:$0xff] }
 0xd0b   :  { %v1569_v8 = vadd.f32 1e-05, %v1565_v7  ;;  %v2258_v7 = vld [vmem:[#allocation10 + $0x38] sm:$0xff] }
 0xd0d   :  { %3364 = vrsqrt.f32 %v1569_v8  ;;  %v3261_v8 = vpack.c.bf16 %v2306_v3, %v2305_v62  ;;  %v2266_v62 = vld [vmem:[#allocation10 + $0x78] sm:$0xff] }
 0xd0e   :  { %v3247_v3 = vpack.c.bf16 %v2266_v62, %v2265_v35 }
 0xd13   :  { %v3363_v10 = vpop.eup %3362 }
 0xd14   :  { %v1576_v12 = vmul.f32 %v3363_v10, %v3975_v49  ;;  %v3231_v10 = vpack.c.bf16 %v2258_v7, %v2257_v4  ;;  %v2297_v4 = vld [vmem:[#allocation10 + $0x170] sm:$0xff]  ;;  %v2298_v7 = vld [vmem:[#allocation10 + $0x178] sm:$0xff] }
 0xd16   :  { %v1586_v15 = vmul.f32 %v3929_v5, %v1576_v12  ;;  %v2289_v12 = vld [vmem:[#allocation10 + $0x130] sm:$0xff] }
 0xd17   :  { %v3365_v13 = vpop.eup %3364 }
 0xd18   :  { %v1596_v16 = vadd.f32 %v3935_v32, %v1586_v15  ;;  %v1577_v17 = vmul.f32 %v3365_v13, %v3980_v11  ;;  %v2267_v11 = vld [vmem:[#allocation10 + $0x80] sm:$0xff]  ;;  %v2290_v15 = vld [vmem:[#allocation10 + $0x138] sm:$0xff] }
 0xd19   :  { %v3263_v13 = vpack.c.bf16 %v2290_v15, %v2289_v12 }
 0xd1a   :  { %1844 = vmatmul.mubr.f32.gmra.mrb[20].mxu0 %v1596_v16  ;;  %1933 = vmatmul.mubr.f32.gmra.mrb[20].mxu1 %v1596_v16  ;;  %v1587_v18 = vmul.f32 %v3929_v5, %v1577_v17  ;;  %v2276_v17 = vld [vmem:[#allocation10 + $0xc8] sm:$0xff] }
 0xd1b   :  { %1849 = vmatprep.mubr.f32.mxu0 %v3583_v9  ;;  %1938 = vmatprep.mubr.f32.mxu1 %v3583_v9 }
 0xd1c   :  { %v1597_v22 = vadd.f32 %v3935_v32, %v1587_v18  ;;  %v2307_v18 = vld [vmem:[#allocation10 + $0x1c0] sm:$0xff] }
 0xd1e   :  { %1850 = vmatmul.mubr.f32.gmra.mrb[22].mxu0 %v1597_v22  ;;  %1939 = vmatmul.mubr.f32.gmra.mrb[22].mxu1 %v1597_v22 }
 0xd1f   :  { %2009 = vmatprep.mubr.f32.mxu0 %v3583_v9  ;;  %2098 = vmatprep.mubr.f32.mxu1 %v3583_v9 }
 0xd22   :  { %2010 = vmatmul.mubr.f32.vlgmr.msra.gmra.mrb[24].mxu0 %v3939_v21  ;;  %2099 = vmatmul.mubr.f32.vlgmr.msra.gmra.mrb[24].mxu1 %v3939_v21 }
 0xd23   :  { %2015 = vmatprep.mubr.f32.mxu0 %v3583_v9  ;;  %2104 = vmatprep.mubr.f32.mxu1 %v3583_v9 }
 0xd26   :  { %2016 = vmatmul.mubr.f32.gmra.mrb[26].mxu0 %v3986_v23  ;;  %2105 = vmatmul.mubr.f32.gmra.mrb[26].mxu1 %v3986_v23  ;;  %v2268_v23 = vld [vmem:[#allocation10 + $0x88] sm:$0xff] }
 0xd27   :  { %2021 = vmatprep.mubr.f32.mxu0 %v3583_v9  ;;  %2110 = vmatprep.mubr.f32.mxu1 %v3583_v9  ;;  %v3217_v30 = vpack.c.bf16 %v2268_v23, %v2267_v11  ;;  %v2308_v11 = vld [vmem:[#allocation10 + $0x1c8] sm:$0xff]  ;;  %v2259_v23 = vld [vmem:[#allocation10 + $0x40] sm:$0xff] }
 0xd28   :  { %v3235_v31 = vpack.c.bf16 %v2260_v26, %v2259_v23  ;;  %v4037_v26 = vld [vmem:[%s4211_s8] sm:$0xff] }
 0xd29   :  { %3218 = vmatprep.subr.bf16.mxu0 %v3217_v30  ;;  %v3265_v30 = vpack.c.bf16 %v2308_v11, %v2307_v18 }
 0xd2a   :  { %2022 = vmatmul.mubr.f32.gmra.mrb[28].mxu0 %v1596_v16  ;;  %2111 = vmatmul.mubr.f32.gmra.mrb[28].mxu1 %v1596_v16  ;;  %v2275_v16 = vld [vmem:[#allocation10 + $0xc0] sm:$0xff] }
 0xd2b   :  { %2027 = vmatprep.mubr.f32.mxu0 %v3583_v9  ;;  %2116 = vmatprep.mubr.f32.mxu1 %v3583_v9  ;;  %v2283_v9 = vld [vmem:[#allocation10 + $0x100] sm:$0xff] }
 0xd2c   :  { %v3251_v41 = vpack.c.bf16 %v2284_v40, %v2283_v9  ;;  %3220 = vmatpush3.bf16.msra.mxu0 %v3219_v1  ;;  %v2277_v1 = vld [vmem:[#allocation10 + $0xd0] sm:$0xff]  ;;  %v2278_v9 = vld [vmem:[#allocation10 + $0xd8] sm:$0xff] }
 0xd2d   :  { %3222 = vmatprep.subr.bf16.mxu0 %v3221_v44  ;;  %v2309_v40 = vld [vmem:[#allocation10 + $0x1d0] sm:$0xff] }
 0xd2e   :  { %2028 = vmatmul.mubr.f32.gmra.mrb[30].mxu0 %v1597_v22  ;;  %2117 = vmatmul.mubr.f32.gmra.mrb[30].mxu1 %v1597_v22  ;;  %v3233_v22 = vpack.c.bf16 %v2276_v17, %v2275_v16  ;;  %v3269_v44 = vpack.c.bf16 %v2310_v2, %v2309_v40 }
 0xd2f   :  { %3252 = vmatpush3.bf16.msra.mxu1 %v3251_v41  ;;  %v3237_v41 = vpack.c.bf16 %v2278_v9, %v2277_v1 }
 0xd30   :  { %3254 = vmatprep.subr.bf16.mxu1 %v3253_v29  ;;  %3224 = vmatpush3.bf16.msra.mxu0 %v3223_v50  ;;  %v3271_v29 = vpack.c.bf16 %v2294_v48, %v2293_v47  ;;  %v2279_v50 = vld [vmem:[#allocation10 + $0xe0] sm:$0xff] }
 0xd31   :  { %3226 = vmatprep.subr.bf16.mxu0 %v3225_v55  ;;  %v3273_v55 = vpack.c.bf16 %v2312_v54, %v2311_v38 }
 0xd33   :  { %3256 = vmatpush3.bf16.msra.mxu1 %v3255_v53  ;;  %v3241_v53 = vpack.c.bf16 %v2280_v37, %v2279_v50 }
 0xd34   :  { %3258 = vmatprep.subr.bf16.mxu1 %v3257_v24  ;;  %3228 = vmatpush3.bf16.msra.mxu0 %v3227_v20  ;;  %v2295_v24 = vld [vmem:[#allocation10 + $0x160] sm:$0xff]  ;;  %v2282_v20 = vld [vmem:[#allocation10 + $0xf8] sm:$0xff] }
 0xd35   :  { %3230 = vmatprep.subr.bf16.mxu0 %v3229_v63  ;;  %v3275_v14 = vpack.c.bf16 %v2296_v39, %v2295_v24  ;;  %v3277_v63 = vpack.c.bf16 %v2314_v61, %v2313_v45 }
 0xd37   :  { %3260 = vmatpush3.bf16.msra.mxu1 %v3259_v60  ;;  %v3245_v60 = vpack.c.bf16 %v2282_v20, %v2281_v59 }
 0xd38   :  { %3262 = vmatprep.subr.bf16.mxu1 %v3261_v8  ;;  %3232 = vmatpush3.bf16.msra.mxu0 %v3231_v10  ;;  %v3279_v8 = vpack.c.bf16 %v2298_v7, %v2297_v4  ;;  %v1727_v10 = vlaneseq }
 0xd39   :  { %3234 = vmatprep.subr.bf16.mxu0 %v3233_v22 }
 0xd3a   :  { %v4020_v12 = vshrl.u32 %v1727_v10, 7 }
 0xd3b   :  { %3264 = vmatpush3.bf16.msra.mxu1 %v3263_v13 }
 0xd3c   :  { %3266 = vmatprep.subr.bf16.mxu1 %v3265_v30  ;;  %3236 = vmatpush3.bf16.msra.mxu0 %v3235_v31  ;;  %v1745_v18 = vsub.s32 4, %v4020_v12  ;;  %v1753_v22 = vsub.s32 6, %v4020_v12  ;;  %v1749_v11 = vsub.s32 5, %v4020_v12  ;;  %v1757_v23 = vsub.s32 7, %v4020_v12 }
 0xd3d   :  { %3238 = vmatprep.subr.bf16.mxu0 %v3237_v41 }
 0xd3e   :  { %v4049_v1 = vrot.slane %v4037_v26, %v1753_v22  ;;  %v4052_v9 = vrot.slane %v4037_v26, %v1749_v11  ;;  %v4055_v40 = vrot.slane %v4037_v26, %v1757_v23 }
 0xd3f   :  { %3268 = vmatpush3.bf16.msra.mxu1 %v3267_v0  ;;  %v1746_v0 = vrot.slane %v4037_v26, %v1745_v18 }
 0xd40   :  { %3270 = vmatprep.subr.bf16.mxu1 %v3269_v44  ;;  %3240 = vmatpush3.bf16.msra.mxu0 %v3239_v46 }
 0xd41   :  { %3242 = vmatprep.subr.bf16.mxu0 %v3241_v53 }
 0xd43   :  { %3272 = vmatpush3.bf16.msra.mxu1 %v3271_v29 }
 0xd44   :  { %3274 = vmatprep.subr.bf16.mxu1 %v3273_v55  ;;  %3244 = vmatpush3.bf16.msra.mxu0 %v3243_v58 }
 0xd45   :  { %3246 = vmatprep.subr.bf16.mxu0 %v3245_v60 }
 0xd47   :  { %3276 = vmatpush3.bf16.msra.mxu1 %v3275_v14 }
 0xd48   :  { %3278 = vmatprep.subr.bf16.mxu1 %v3277_v63  ;;  %3248 = vmatpush3.bf16.msra.mxu0 %v3247_v3 }
 0xd4b   :  { %3280 = vmatpush3.bf16.msra.mxu1 %v3279_v8 }
 0xd61   :  { %v4012_v5 = vpop.f32.mrb[18].mxu0  ;;  %v4014_v32 = vpop.f32.mrb[18].mxu1 }
 0xd62   :  { %v4016_v21 = vpop.f32.mrb[19].mxu0  ;;  %v4018_v49 = vpop.f32.mrb[19].mxu1 }
 0xded   :  { %v4022_v15 = vpop.f32.mrb[20].mxu0  ;;  %v4024_v13 = vpop.f32.mrb[20].mxu1 }
 0xdee   :  { %v4026_v16 = vpop.f32.mrb[21].mxu0  ;;  %v4028_v17 = vpop.f32.mrb[21].mxu1 }
 0xdf1   :  { %v4039_v30 = vpop.f32.mrb[22].mxu0  ;;  %v4041_v31 = vpop.f32.mrb[22].mxu1 }
 0xdf2   :  { %v4043_v34 = vpop.f32.mrb[23].mxu0  ;;  %v4045_v36 = vpop.f32.mrb[23].mxu1 }
 0xdf5   :  { %v2011_v41 = vpop.f32.mrb[24].mxu0  ;;  %v2100_v2 = vpop.f32.mrb[24].mxu1 }
 0xdf6   :  { %v4057_v42 = vadd.f32 %v2011_v41, %v1746_v0  ;;  %v4060_v43 = vadd.f32 %v2100_v2, %v4049_v1  ;;  %v2013_v44 = vpop.f32.mrb[25].mxu0  ;;  %v2102_v46 = vpop.f32.mrb[25].mxu1 }
 0xdf7   :  { %v4063_v47 = vadd.f32 %v2013_v44, %v4052_v9  ;;  %v4066_v48 = vadd.f32 %v2102_v46, %v4055_v40 }
 0xdf8   :  { %v2554_v29 = vmul.f32 -1.442695, %v4057_v42  ;;  %v2556_v50 = vmul.f32 -1.442695, %v4060_v43 }
 0xdf9   :  { %v2555_v37 = vmul.f32 -1.442695, %v4063_v47  ;;  %v2557_v38 = vmul.f32 -1.442695, %v4066_v48  ;;  %v2017_v53 = vpop.f32.mrb[26].mxu0  ;;  %v2106_v54 = vpop.f32.mrb[26].mxu1 }
 0xdfa   :  { %3366 = vpow2.f32 %v2554_v29  ;;  %v4072_v28 = vadd.f32 %v2017_v53, %v1746_v0  ;;  %v4075_v27 = vadd.f32 %v2106_v54, %v4049_v1  ;;  %v2019_v55 = vpop.f32.mrb[27].mxu0  ;;  %v2108_v58 = vpop.f32.mrb[27].mxu1 }
 0xdfb   :  { %3368 = vpow2.f32 %v2556_v50  ;;  %v4078_v24 = vadd.f32 %v2019_v55, %v4052_v9  ;;  %v4081_v39 = vadd.f32 %v2108_v58, %v4055_v40 }
 0xdfc   :  { %3370 = vpow2.f32 %v2555_v37  ;;  %v2558_v14 = vmul.f32 -1.442695, %v4072_v28  ;;  %v2560_v59 = vmul.f32 -1.442695, %v4075_v27 }
 0xdfd   :  { %3372 = vpow2.f32 %v2557_v38  ;;  %v2559_v20 = vmul.f32 -1.442695, %v4078_v24  ;;  %v2561_v45 = vmul.f32 -1.442695, %v4081_v39  ;;  %v2023_v60 = vpop.f32.mrb[28].mxu0  ;;  %v2112_v61 = vpop.f32.mrb[28].mxu1 }
 0xdfe   :  { %3374 = vpow2.f32 %v2558_v14  ;;  %v4087_v35 = vadd.f32 %v2023_v60, %v1746_v0  ;;  %v4090_v62 = vadd.f32 %v2112_v61, %v4049_v1  ;;  %v2025_v63 = vpop.f32.mrb[29].mxu0  ;;  %v2114_v3 = vpop.f32.mrb[29].mxu1 }
 0xdff   :  { %3376 = vpow2.f32 %v2560_v59  ;;  %v4093_v4 = vadd.f32 %v2025_v63, %v4052_v9  ;;  %v4096_v7 = vadd.f32 %v2114_v3, %v4055_v40  ;;  %v1737_v63 = vsub.s32 2, %v4020_v12 }
 0xe00   :  { %3378 = vpow2.f32 %v2559_v20  ;;  %v2562_v8 = vmul.f32 -1.442695, %v4087_v35  ;;  %v2564_v10 = vmul.f32 -1.442695, %v4090_v62 }
 0xe01   :  { %3380 = vpow2.f32 %v2561_v45  ;;  %v2563_v18 = vmul.f32 -1.442695, %v4093_v4  ;;  %v2565_v22 = vmul.f32 -1.442695, %v4096_v7  ;;  %v2029_v11 = vpop.f32.mrb[30].mxu0  ;;  %v2118_v23 = vpop.f32.mrb[30].mxu1 }
 0xe02   :  { %3382 = vpow2.f32 %v2562_v8  ;;  %v4102_v41 = vadd.f32 %v2029_v11, %v1746_v0  ;;  %v2031_v2 = vpop.f32.mrb[31].mxu0  ;;  %v2120_v44 = vpop.f32.mrb[31].mxu1  ;;  %v1729_v45 = vsub.s32 0, %v4020_v12 }
 0xe03   :  { %3384 = vpow2.f32 %v2564_v10  ;;  %v1733_v10 = vsub.s32 1, %v4020_v12 }
 0xe04   :  { %v3367_v46 = vpop.eup %3366  ;;  %3386 = vpow2.f32 %v2563_v18  ;;  %v2566_v29 = vmul.f32 -1.442695, %v4102_v41 }
 0xe05   :  { %v3369_v50 = vpop.eup %3368  ;;  %v2171_v37 = vadd.f32 1.0, %v3367_v46  ;;  %3388 = vpow2.f32 %v2565_v22  ;;  %v4109_v22 = vadd.f32 %v2118_v23, %v4049_v1  ;;  %v1741_v46 = vsub.s32 3, %v4020_v12 }
 0xe06   :  { %v3371_v38 = vpop.eup %3370  ;;  %v2173_v53 = vadd.f32 1.0, %v3369_v50  ;;  %3390 = vpow2.f32 %v2566_v29  ;;  %v4113_v50 = vadd.f32 %v2031_v2, %v4052_v9  ;;  %v4122_v1 = vrot.slane %v4037_v26, %v1737_v63 }
 0xe07   :  { %v3373_v54 = vpop.eup %3372  ;;  %3392 = vrcp.f32 %v2171_v37  ;;  %v2172_v55 = vadd.f32 1.0, %v3371_v38  ;;  %v4116_v38 = vrot.slane %v4037_v26, %v1729_v45  ;;  %v2568_v2 = vmul.f32 -1.442695, %v4109_v22 }
 0xe08   :  { %v3375_v58 = vpop.eup %3374  ;;  %3394 = vrcp.f32 %v2173_v53  ;;  %v2174_v0 = vadd.f32 1.0, %v3373_v54  ;;  %v4119_v54 = vadd.f32 %v2120_v44, %v4055_v40  ;;  %v2567_v44 = vmul.f32 -1.442695, %v4113_v50 }
 0xe09   :  { %v3377_v14 = vpop.eup %3376  ;;  %3396 = vrcp.f32 %v2172_v55  ;;  %v2175_v59 = vadd.f32 1.0, %v3375_v58  ;;  %v4125_v58 = vrot.slane %v4037_v26, %v1733_v10  ;;  %v1923_v63 = vadd.f32 %v3970_v56, %v4122_v1 }
 0xe0a   :  { %v3379_v20 = vpop.eup %3378  ;;  %3398 = vrcp.f32 %v2174_v0  ;;  %v2177_v60 = vadd.f32 1.0, %v3377_v14  ;;  %v4129_v14 = vrot.slane %v4037_v26, %v1741_v46 }
 0xe0b   :  { %v3381_v61 = vpop.eup %3380  ;;  %3400 = vrcp.f32 %v2175_v59  ;;  %v2176_v3 = vadd.f32 1.0, %v3379_v20  ;;  %v1834_v20 = vadd.f32 %v3959_v51, %v4116_v38 }
 0xe0c   :  { %v3383_v8 = vpop.eup %3382  ;;  %3402 = vrcp.f32 %v2177_v60  ;;  %v2178_v18 = vadd.f32 1.0, %v3381_v61  ;;  %v2569_v60 = vmul.f32 -1.442695, %v4119_v54 }
 0xe0d   :  { %v3385_v11 = vpop.eup %3384  ;;  %3404 = vrcp.f32 %v2176_v3  ;;  %v2179_v29 = vadd.f32 1.0, %v3383_v8  ;;  %v1836_v8 = vadd.f32 %v3961_v52, %v4125_v58 }
 0xe0e   :  { %v3387_v37 = vpop.eup %3386  ;;  %3406 = vrcp.f32 %v2178_v18  ;;  %v2181_v53 = vadd.f32 1.0, %v3385_v11 }
 0xe0f   :  { %v3389_v55 = vpop.eup %3388  ;;  %3408 = vrcp.f32 %v2179_v29  ;;  %v2180_v12 = vadd.f32 1.0, %v3387_v37 }
 0xe10   :  { %v3391_v23 = vpop.eup %3390  ;;  %3410 = vrcp.f32 %v2181_v53  ;;  %v2182_v9 = vadd.f32 1.0, %v3389_v55 }
 0xe11   :  { %v3393_v0 = vpop.eup %3392  ;;  %3412 = vrcp.f32 %v2180_v12  ;;  %v2183_v40 = vadd.f32 1.0, %v3391_v23 }
 0xe12   :  { %v3395_v59 = vpop.eup %3394  ;;  %v2219_v45 = vmul.f32 %v3393_v0, %v4057_v42  ;;  %3414 = vrcp.f32 %v2182_v9  ;;  %v1925_v42 = vadd.f32 %v3972_v57, %v4129_v14 }
 0xe13   :  { %v3397_v61 = vpop.eup %3396  ;;  %v2221_v26 = vmul.f32 %v3395_v59, %v4060_v43  ;;  %3416 = vrcp.f32 %v2183_v40  ;;  %v1840_v43 = vadd.f32 %v4012_v5, %v4116_v38  ;;  %v1935_v40 = vadd.f32 %v4024_v13, %v4122_v1 }
 0xe14   :  { %v3399_v3 = vpop.eup %3398  ;;  %v2235_v10 = vmul.f32 %v2219_v45, %v1834_v20  ;;  %v2220_v18 = vmul.f32 %v3397_v61, %v4063_v47  ;;  %3418 = vpow2.f32 %v2568_v2  ;;  %v1929_v47 = vadd.f32 %v4014_v32, %v4122_v1 }
 0xe15   :  { %v3401_v51 = vpop.eup %3400  ;;  %v2237_v11 = vmul.f32 %v2221_v26, %v1923_v63  ;;  %v2222_v46 = vmul.f32 %v3399_v3, %v4066_v48  ;;  %3420 = vpow2.f32 %v2567_v44  ;;  %v1842_v48 = vadd.f32 %v4016_v21, %v4125_v58 }
 0xe16   :  { %v3403_v56 = vpop.eup %3402  ;;  %v2223_v29 = vmul.f32 %v3401_v51, %v4072_v28  ;;  %3422 = vpow2.f32 %v2569_v60  ;;  %v2236_v52 = vmul.f32 %v2220_v18, %v1836_v8  ;;  %v1931_v28 = vadd.f32 %v4018_v49, %v4129_v14 }
 0xe17   :  { %v3405_v37 = vpop.eup %3404  ;;  %v2225_v53 = vmul.f32 %v3403_v56, %v4075_v27  ;;  %v2238_v55 = vmul.f32 %v2222_v46, %v1925_v42  ;;  %v1846_v27 = vadd.f32 %v4022_v15, %v4116_v38  ;;  %v1854_v42 = vadd.f32 %v4043_v34, %v4125_v58  ;;  %v2570_v34 = vld [vmem:[%s4213_s10] ss:$0 sm:$0xff]  ;;  %s3584_s10 = smov [#allocation11]  }
 0xe18   :  { %v3407_v57 = vpop.eup %3406  ;;  %v2224_v12 = vmul.f32 %v3405_v37, %v4078_v24  ;;  %2385 = vmatprep.mubr.f32.mxu0 %v2236_v52  ;;  %v2239_v23 = vmul.f32 %v2223_v29, %v1840_v43  ;;  %v1943_v46 = vadd.f32 %v4045_v36, %v4129_v14  ;;  %s2504_s29 = sshll.u32 %s3584_s10, 4  ;;  %s2505_s29 = int_to_ptr.vmem [resolvable:$true] %s2504_s29 }
 0xe19   :  { %v3409_v5 = vpop.eup %3408  ;;  %v2226_v9 = vmul.f32 %v3407_v57, %v4081_v39  ;;  %2470 = vmatprep.mubr.f32.mxu1 %v2238_v55  ;;  %2386 = vmatmul.mubr.f32.vlgmr.msra.gmra.mrb[32].mxu0 %v2235_v10  ;;  %v2241_v32 = vmul.f32 %v2225_v53, %v1929_v47  ;;  %v1848_v39 = vadd.f32 %v4026_v16, %v4125_v58  ;;  %s3542_s30 = scalar_lea.vmem %s2505_s29, 512  ;;  %p3547_p13 = scmp.lt.s32.totalorder %s2505_s29, %s2505_s29 }
 0xe1a   :  { %v3411_v2 = vpop.eup %3410  ;;  %v2227_v0 = vmul.f32 %v3409_v5, %v4087_v35  ;;  %2471 = vmatmul.mubr.f32.vlgmr.msra.gmra.mrb[32].mxu1 %v2237_v11  ;;  %v2240_v21 = vmul.f32 %v2224_v12, %v1842_v48  ;;  %v1937_v35 = vadd.f32 %v4028_v17, %v4129_v14  ;;  %p3543_p12 = scmp.ne.s32.totalorder %s2505_s29, %s3542_s30  ;;  %p3548_p0 = scmp.lt.s32.totalorder %s3542_s30, %s3542_s30 }
 0xe1b   :  { %v3413_v24 = vpop.eup %3412  ;;  %v2229_v44 = vmul.f32 %v3411_v2, %v4090_v62  ;;  %v2242_v49 = vmul.f32 %v2226_v9, %v1931_v28  ;;  %v1852_v62 = vadd.f32 %v4039_v30, %v4116_v38 }
 0xe1c   :  { %v3415_v59 = vpop.eup %3414  ;;  %v2228_v20 = vmul.f32 %v3413_v24, %v4093_v4  ;;  %2390 = vmatprep.mubr.f32.mxu0 %v2240_v21  ;;  %v2243_v45 = vmul.f32 %v2227_v0, %v1846_v27  ;;  %p3549_p1 = por %p3548_p0, %p3547_p13 }
 0xe1d   :  { %v3417_v15 = vpop.eup %3416  ;;  %v2230_v60 = vmul.f32 %v3415_v59, %v4096_v7  ;;  %2475 = vmatprep.mubr.f32.mxu1 %v2242_v49  ;;  %2391 = vmatmul.mubr.f32.gmra.mrb[34].mxu0 %v2239_v23  ;;  %v2245_v13 = vmul.f32 %v2229_v44, %v1935_v40 }
 0xe1e   :  { %v3419_v61 = vpop.eup %3418  ;;  %v2231_v63 = vmul.f32 %v3417_v15, %v4102_v41  ;;  %2476 = vmatmul.mubr.f32.gmra.mrb[34].mxu1 %v2241_v32  ;;  %v2244_v16 = vmul.f32 %v2228_v20, %v1848_v39  ;;  %v1941_v41 = vadd.f32 %v4041_v31, %v4122_v1  ;;  %p3550_p2 = pnand %p3549_p1, %p3543_p12 }
 0xe1f   :  { %v3421_v4 = vpop.eup %3420  ;;  %v2185_v26 = vadd.f32 1.0, %v3419_v61  ;;  %v2246_v3 = vmul.f32 %v2230_v60, %v1937_v35 }
 0xe20   :  { %v3423_v8 = vpop.eup %3422  ;;  %v2184_v10 = vadd.f32 1.0, %v3421_v4  ;;  %2395 = vmatprep.mubr.f32.mxu0 %v2244_v16  ;;  %v2247_v17 = vmul.f32 %v2231_v63, %v1852_v62 }
 0xe21   :  { %3424 = vrcp.f32 %v2185_v26  ;;  %v2186_v7 = vadd.f32 1.0, %v3423_v8  ;;  %2480 = vmatprep.mubr.f32.mxu1 %v2246_v3  ;;  %2396 = vmatmul.mubr.f32.gmra.mrb[36].mxu0 %v2243_v45 }
 0xe22   :  { %3426 = vrcp.f32 %v2184_v10  ;;  %2481 = vmatmul.mubr.f32.gmra.mrb[36].mxu1 %v2245_v13 }
 0xe23   :  { %3428 = vrcp.f32 %v2186_v7 }
 0xe2b   :  { %v3425_v18 = vpop.eup %3424 }
 0xe2c   :  { %v3427_v30 = vpop.eup %3426  ;;  %v2233_v38 = vmul.f32 %v3425_v18, %v4109_v22 }
 0xe2d   :  { %v3429_v51 = vpop.eup %3428  ;;  %v2232_v11 = vmul.f32 %v3427_v30, %v4113_v50 }
 0xe2e   :  { %v2234_v56 = vmul.f32 %v3429_v51, %v4119_v54  ;;  %v2249_v43 = vmul.f32 %v2233_v38, %v1941_v41 }
 0xe2f   :  { %v2248_v29 = vmul.f32 %v2232_v11, %v1854_v42 }
 0xe30   :  { %v2250_v52 = vmul.f32 %v2234_v56, %v1943_v46 }
 0xe31   :  { %2400 = vmatprep.mubr.f32.mxu0 %v2248_v29 }
 0xe32   :  { %2485 = vmatprep.mubr.f32.mxu1 %v2250_v52  ;;  %2401 = vmatmul.mubr.f32.gmra.mrb[38].mxu0 %v2247_v17 }
 0xe33   :  { %2486 = vmatmul.mubr.f32.gmra.mrb[38].mxu1 %v2249_v43 }
 0xeec   :  { %v2695_v31 = vpop.f32.mrb[32].mxu0 }
 0xeed   :  { %v2739_v22 = vpop.f32.mrb[32].mxu1  ;;  %v2696_v1 = vpop.f32.mrb[33].mxu0 }
 0xeee   :  { %v2697_v50 = vadd.f32 %v2696_v1, %v2695_v31  ;;  %v2740_v58 = vpop.f32.mrb[33].mxu1 }
 0xeef   :  { %v2741_v37 = vadd.f32 %v2740_v58, %v2739_v22 }
 0xef0   :  { %v2388_v36 = vadd.f32 %v2697_v50, %v2570_v34  ;;  %v2698_v14 = vpop.f32.mrb[34].mxu0 }
 0xef1   :  { %v2742_v54 = vpop.f32.mrb[34].mxu1  ;;  %v2699_v47 = vpop.f32.mrb[35].mxu0 }
 0xef2   :  { %v2473_v53 = vadd.f32 %v2741_v37, %v2388_v36  ;;  %v2700_v55 = vadd.f32 %v2699_v47, %v2698_v14  ;;  %v2743_v57 = vpop.f32.mrb[35].mxu1 }
 0xef3   :  { %v2744_v48 = vadd.f32 %v2743_v57, %v2742_v54 }
 0xef4   :  { %v2491_v12 = vadd.f32 %v2473_v53, %v3889_v6  ;;  %v2393_v23 = vadd.f32 %v2700_v55, %v2570_v34  ;;  %v2701_v5 = vpop.f32.mrb[36].mxu0 }
 0xef5   :  { %v2745_v28 = vpop.f32.mrb[36].mxu1  ;;  %v2702_v9 = vpop.f32.mrb[37].mxu0 }
 0xef6   :  { %2495 = vst [vmem:[#allocation11] sm:$0xff] %v2491_v12  ;;  %v2478_v32 = vadd.f32 %v2744_v48, %v2393_v23  ;;  %v2703_v2 = vadd.f32 %v2702_v9, %v2701_v5  ;;  %v2746_v27 = vpop.f32.mrb[37].mxu1 }
 0xef7   :  { %v2747_v0 = vadd.f32 %v2746_v27, %v2745_v28 }
 0xef8   :  { %v2492_v21 = vadd.f32 %v2478_v32, %v3893_v19  ;;  %v2398_v24 = vadd.f32 %v2703_v2, %v2570_v34 }
 0xefa   :  { %2496 = vst [vmem:[#allocation11 + $0x8] sm:$0xff] %v2492_v21  ;;  %v2483_v40 = vadd.f32 %v2747_v0, %v2398_v24 }
 0xefc   :  { %v2493_v44 = vadd.f32 %v2483_v40, %v3963_v25 }
 0xefe   :  { %2497 = vst [vmem:[#allocation11 + $0x10] sm:$0xff] %v2493_v44 }
 0xf05   :  { %v2704_v49 = vpop.f32.mrb[38].mxu0 }
 0xf06   :  { %v2748_v59 = vpop.f32.mrb[38].mxu1  ;;  %v2705_v6 = vpop.f32.mrb[39].mxu0 }
 0xf07   :  { %v2706_v39 = vadd.f32 %v2705_v6, %v2704_v49  ;;  %v2749_v20 = vpop.f32.mrb[39].mxu1 }
 0xf08   :  { %v2750_v45 = vadd.f32 %v2749_v20, %v2748_v59 }
 0xf09   :  { %v2403_v15 = vadd.f32 %v2706_v39, %v2570_v34 }
 0xf0b   :  { %v2488_v35 = vadd.f32 %v2750_v45, %v2403_v15 }
 0xf0d   :  { %v2494_v60 = vadd.f32 %v2488_v35, %v3967_v33 }
 0xf0f   :  { %2498 = vst [vmem:[#allocation11 + $0x18] sm:$0xff] %v2494_v60 }
 0xf10   :  { %3553 = shalt.err (!%p3550_p2)
}
 0xf11   :  { %s3554_s12 = scalar_lea.hbm %s4214_s11, 512 }
 0xf12   :  { %p3555_p3 = scmp.ne.s32.totalorder %s4214_s11, %s3554_s12  ;;  %p3558_p4 = scmp.lt.u32.totalorder %s3554_s12, %s4214_s11 }
 0xf14   :  { %p3560_p5 = pnand %p3558_p4, %p3555_p3 }
 0xf16   :  { %3563 = shalt.err (!%p3560_p5)
}
 0xf17   :  { %2510 = dma.vmem_to_hbm [thread:$0]  %s2505_s29, 512, %s4214_s11, [#allocation4], %s3579_s7, %s3579_s7, %s3580_s13  }
 0xf18   :  { %3570 = dma.done.wait [#allocation4], 512  }
 0xf19   :  { %3571 = vsyncadd [#allocation4], 4294966784 }
 0xf1a   :  { %2514 = vsyncpa [#allocation3], 1 }
 0xf1b   :  { %2515 = vsyncpa [#allocation6], 1 }
 0xf1c   :  { %2516 = vsyncpa [#allocation9], 1 }
 0xf1d   :  { %2517 = vsyncpa [#allocation4], 1 }

</bundles_post_ra>
